<compile_context>
chip_gen: v6e
topology: v6e:2x2x1
jax: 0.10.0
libtpu: 0.0.40
codegen_flags: <defaults>
</compile_context>

<pallas_src>
import functools

import jax
import jax.numpy as jnp
from jax.experimental import pallas as pl
from jax.experimental.pallas import tpu as pltpu


def _round_up(x, m):
    return (x + m - 1) // m * m


# ------------------------------- fused kernel --------------------------------


def _make_kernel(num_layers, hid_p):
    """Ref order: ids, h0, emb, gru_w, gru_b, lin_w, lin_b,
                  logits_out, h_out, h_scratch."""

    def kernel(ids_ref, h0_ref, emb_ref, gw_ref, gb_ref, lw_ref, lb_ref,
               logits_ref, h_out_ref, h_scr):
        t = pl.program_id(0)

        # Load the initial hidden state into the VMEM carry once.
        @pl.when(t == 0)
        def _():
            h_scr[...] = h0_ref[...]

        batch = ids_ref.shape[1]
        voc_p = emb_ref.shape[0]
        xw = emb_ref.shape[1]          # lane width of the "x" slot of the fused operand
        hp = hid_p

        # Embedding lookup as an exact one-hot matmul (table is VMEM-resident).
        ids = ids_ref[0]                                            # [B, 1] int32
        lane = jax.lax.broadcasted_iota(jnp.int32, (batch, voc_p), 1)
        onehot = (lane == ids).astype(jnp.bfloat16)                 # no f32 select
        x = jnp.dot(onehot, emb_ref[...],
                    preferred_element_type=jnp.float32)             # [B, xw] f32

        for i in range(num_layers):
            h_prev = h_scr[i]                                       # [B, Hp] f32
            xi = x
            if xi.shape[1] < xw:        # only if emb_p != hid_p (zero weight rows there)
                xi = jnp.pad(xi, ((0, 0), (0, xw - xi.shape[1])))
            # Single fused matmul per layer: operand [B, xw + Hp] (K = 256 for
            # H <= 128), weight columns [r | z | i_n | h_n], f32 accumulation.
            cat = jnp.concatenate(
                [xi.astype(jnp.bfloat16), h_prev.astype(jnp.bfloat16)], axis=1)
            g = jnp.dot(cat, gw_ref[i],
                        preferred_element_type=jnp.float32) + gb_ref[i]  # [B, 4Hp]

            r = jax.nn.sigmoid(g[:, 0:hp])
            z = jax.nn.sigmoid(g[:, hp:2 * hp])
            n = jnp.tanh(g[:, 2 * hp:3 * hp] + r * g[:, 3 * hp:4 * hp])
            h_new = (1.0 - z) * n + z * h_prev                      # f32 [B, Hp]

            h_scr[i] = h_new
            x = h_new

        # Lane-dense per-step logits block [1, B, Vp].
        logits_ref[0] = jnp.dot(x.astype(jnp.bfloat16), lw_ref[...],
                                preferred_element_type=jnp.float32) + lb_ref[...]

        # Write the carried hidden state back only once, at the final step.
        @pl.when(t == pl.num_programs(0) - 1)
        def _():
            h_out_ref[...] = h_scr[...]

    return kernel


# --------------------------------- wrappers -----------------------------------


@functools.partial(jax.jit, static_argnames=("voc_size",))
def multigru_forward_seq(packed, x_seq, h, *, voc_size):
    """Applies MultiGRU.forward once per time step (teacher-forced inputs)
    inside a single pallas_call.

    x_seq : [T, B] int32 token ids
    h     : [L, B, H] float32 initial hidden state
    returns (logits [T, B, V], h_out [L, B, H])
    """
    num_layers = packed["gru_w"].shape[0]
    hid_p = packed["lin_w"].shape[0]
    voc_p = packed["lin_w"].shape[1]
    seq_len, batch = x_seq.shape
    hid = h.shape[-1]

    ids3 = x_seq.reshape(seq_len, batch, 1).astype(jnp.int32)
    # Zero-pad h to Hp lanes; padded lanes stay exactly zero inside the kernel.
    h_pad = jnp.pad(h.astype(jnp.float32), ((0, 0), (0, 0), (0, hid_p - hid)))

    const3 = lambda t: (0, 0, 0)
    const2 = lambda t: (0, 0)

    grid_spec = pltpu.PrefetchScalarGridSpec(
        num_scalar_prefetch=0,
        grid=(seq_len,),
        in_specs=[
            pl.BlockSpec((1, batch, 1), lambda t: (t, 0, 0)),        # ids[t]
            pl.BlockSpec(h_pad.shape, const3),                       # h0 (once)
            pl.BlockSpec(packed["emb"].shape, const2),               # VMEM-resident
            pl.BlockSpec(packed["gru_w"].shape, const3),             # VMEM-resident
            pl.BlockSpec(packed["gru_b"].shape, const3),             # VMEM-resident
            pl.BlockSpec(packed["lin_w"].shape, const2),             # VMEM-resident
            pl.BlockSpec(packed["lin_b"].shape, const2),             # VMEM-resident
        ],
        out_specs=(
            pl.BlockSpec((1, batch, voc_p), lambda t: (t, 0, 0)),    # logits[t]
            pl.BlockSpec((num_layers, batch, hid_p), const3),        # final h
        ),
        scratch_shapes=[pltpu.VMEM((num_layers, batch, hid_p), jnp.float32)],
    )

    logits_pad, h_out_pad = pl.pallas_call(
        _make_kernel(num_layers, hid_p),
        grid_spec=grid_spec,
        out_shape=(
            jax.ShapeDtypeStruct((seq_len, batch, voc_p), jnp.float32),
            jax.ShapeDtypeStruct((num_layers, batch, hid_p), jnp.float32),
        ),
        compiler_params=pltpu.CompilerParams(
            dimension_semantics=("arbitrary",)),     # sequential recurrence axis
    )(ids3, h_pad, packed["emb"], packed["gru_w"], packed["gru_b"],
      packed["lin_w"], packed["lin_b"])

    return logits_pad[:, :, :voc_size], h_out_pad[:, :, :hid]


def multigru_forward(packed, x_ids, h, *, voc_size):
    """Single-step API matching MultiGRU.forward: x_ids [B], h [L, B, H]."""
    logits, h_out = multigru_forward_seq(packed, x_ids[None, :], h,
                                         voc_size=voc_size)
    return logits[0], h_out


# ---------------------------- params (torch layout) ---------------------------


def init_multigru_params(key, voc_size, gru_layer_size=64, num_gru_layers=3,
                         embedding_layer_size=32):
    """Deterministic synthetic parameters in PyTorch layout (f32)."""
    keys = jax.random.split(key, 3 + 2 * num_gru_layers)
    k_emb, k_lin_w, k_lin_b = keys[0], keys[1], keys[2]
    params = {
        "embedding": jax.random.normal(k_emb, (voc_size, embedding_layer_size),
                                       jnp.float32) * 0.1,
    }
    gru = []
    in_size = embedding_layer_size
    scale = 1.0 / float(gru_layer_size) ** 0.5
    for i in range(num_gru_layers):
        kw, kb = keys[3 + 2 * i], keys[4 + 2 * i]
        kw1, kw2 = jax.random.split(kw)
        kb1, kb2 = jax.random.split(kb)
        gru.append({
            # torch nn.GRUCell layout: weight_ih [3H, In], weight_hh [3H, H]
            "weight_ih": jax.random.uniform(kw1, (3 * gru_layer_size, in_size),
                                            jnp.float32, -scale, scale),
            "weight_hh": jax.random.uniform(kw2, (3 * gru_layer_size, gru_layer_size),
                                            jnp.float32, -scale, scale),
            "bias_ih": jax.random.uniform(kb1, (3 * gru_layer_size,),
                                          jnp.float32, -scale, scale),
            "bias_hh": jax.random.uniform(kb2, (3 * gru_layer_size,),
                                          jnp.float32, -scale, scale),
        })
        in_size = gru_layer_size
    params["gru"] = gru
    # torch nn.Linear layout: weight [V, H], bias [V]
    params["linear_w"] = jax.random.normal(k_lin_w, (voc_size, gru_layer_size),
                                           jnp.float32) * 0.1
    params["linear_b"] = jax.random.normal(k_lin_b, (voc_size,), jnp.float32) * 0.1
    return params


def pack_params_for_kernel(raw):
    """Pack torch-layout params into the fused kernel layout.

    Per layer one weight block  Wf [Kp, 4*Hp]  (bf16), column blocks
    [r | z | i_n | h_n], rows [0:xw] = W_i*^T (x slot), rows [xw:Kp] = W_h*^T
    (h slot); one bias row [1, 4*Hp] (f32) = [b_ir+b_hr | b_iz+b_hz | b_in | b_hn].
    All padded rows/cols/lanes are exactly zero (required so padded h lanes
    stay zero and never leak into real lanes).
    """
    voc, emb = raw["embedding"].shape
    hid = raw["gru"][0]["weight_hh"].shape[1]
    voc_p = _round_up(voc, 128)
    hid_p = _round_up(hid, 128)
    emb_p = _round_up(emb, 128)
    xw = max(emb_p, hid_p)       # lane width of the x slot in the fused operand
    kp = xw + hid_p              # fused contraction depth (256 on v6e/v7x for H<=128)
    gp = 4 * hid_p

    def pad_to(a, shape):
        return jnp.pad(a, [(0, s - d) for s, d in zip(shape, a.shape)])

    def place(dst, r0, c0, a):
        return dst.at[r0:r0 + a.shape[0], c0:c0 + a.shape[1]].set(a)

    gw, gb = [], []
    for lay in raw["gru"]:
        w_ih_t = lay["weight_ih"].T          # [In, 3H], gate blocks (r, z, n)
        w_hh_t = lay["weight_hh"].T          # [H, 3H]
        wf = jnp.zeros((kp, gp), jnp.float32)
        # r gate
        wf = place(wf, 0, 0, w_ih_t[:, 0:hid])
        wf = place(wf, xw, 0, w_hh_t[:, 0:hid])
        # z gate
        wf = place(wf, 0, hid_p, w_ih_t[:, hid:2 * hid])
        wf = place(wf, xw, hid_p, w_hh_t[:, hid:2 * hid])
        # i_n block (x rows only)
        wf = place(wf, 0, 2 * hid_p, w_ih_t[:, 2 * hid:3 * hid])
        # h_n block (h rows only)
        wf = place(wf, xw, 3 * hid_p, w_hh_t[:, 2 * hid:3 * hid])
        gw.append(wf)

        b_ih, b_hh = lay["bias_ih"], lay["bias_hh"]
        padb = lambda v: jnp.pad(v, (0, hid_p - hid))
        gb.append(jnp.concatenate([
            padb(b_ih[0:hid] + b_hh[0:hid]),
            padb(b_ih[hid:2 * hid] + b_hh[hid:2 * hid]),
            padb(b_ih[2 * hid:3 * hid]),
            padb(b_hh[2 * hid:3 * hid]),
        ])[None, :])

    return {
        "emb": pad_to(raw["embedding"], (voc_p, xw)).astype(jnp.bfloat16),
        "gru_w": jnp.stack(gw).astype(jnp.bfloat16),          # [L, Kp, 4Hp]
        "gru_b": jnp.stack(gb).astype(jnp.float32),           # [L, 1, 4Hp]
        "lin_w": pad_to(raw["linear_w"].T, (hid_p, voc_p)).astype(jnp.bfloat16),
        "lin_b": pad_to(raw["linear_b"][None, :], (1, voc_p)).astype(jnp.float32),
    }


# ----------------------------- reference (pure JAX) ---------------------------


def _ref_forward(raw, x_ids, h):
    """Pure-JAX single-step reference. Intentionally mirrors the kernel's bf16
    weight/activation quantization (validation is against the bf16 model)."""
    q = lambda a: a.astype(jnp.bfloat16).astype(jnp.float32)
    hid = h.shape[-1]
    x = q(raw["embedding"])[x_ids]
    h_outs = []
    for i, lay in enumerate(raw["gru"]):
        gi = jnp.dot(q(x), q(lay["weight_ih"]).T,
                     precision=jax.lax.Precision.HIGHEST) + lay["bias_ih"]
        gh = jnp.dot(q(h[i]), q(lay["weight_hh"]).T,
                     precision=jax.lax.Precision.HIGHEST) + lay["bias_hh"]
        r = jax.nn.sigmoid(gi[:, :hid] + gh[:, :hid])
        z = jax.nn.sigmoid(gi[:, hid:2 * hid] + gh[:, hid:2 * hid])
        n = jnp.tanh(gi[:, 2 * hid:] + r * gh[:, 2 * hid:])
        x = (1.0 - z) * n + z * h[i]
        h_outs.append(x)
    logits = jnp.dot(q(x), q(raw["linear_w"]).T,
                     precision=jax.lax.Precision.HIGHEST) + raw["linear_b"]
    return logits, jnp.stack(h_outs, axis=0)


def _ref_forward_seq(raw, x_seq, h):
    logits_all = []
    for t in range(x_seq.shape[0]):
        logits, h = _ref_forward(raw, x_seq[t], h)
        logits_all.append(logits)
    return jnp.stack(logits_all, axis=0), h


# ------------------------------------ main -----------------------------------


if __name__ == "__main__":
    VOC = 24
    EMB = 32
    HID = 64
    LAYERS = 3
    BATCH = 16    # demo size; production REINVENT should use B >= 128
    SEQ = 8

    key = jax.random.PRNGKey(0)
    k_params, k_x, k_h = jax.random.split(key, 3)

    raw = init_multigru_params(k_params, VOC, gru_layer_size=HID,
                               num_gru_layers=LAYERS,
                               embedding_layer_size=EMB)
    packed = pack_params_for_kernel(raw)

    x_seq = jax.random.randint(k_x, (SEQ, BATCH), 0, VOC, dtype=jnp.int32)
    h0 = jax.random.normal(k_h, (LAYERS, BATCH, HID), jnp.float32) * 0.5

    # Multi-step rollout: one pallas_call for all SEQ forward steps.
    logits_seq, h_out = multigru_forward_seq(packed, x_seq, h0, voc_size=VOC)
    jax.block_until_ready((logits_seq, h_out))

    ref_logits_seq, ref_h = _ref_forward_seq(raw, x_seq, h0)
    assert logits_seq.shape == (SEQ, BATCH, VOC)
    assert h_out.shape == (LAYERS, BATCH, HID)
    assert jnp.allclose(logits_seq, ref_logits_seq, atol=5e-3, rtol=5e-3), \
        float(jnp.max(jnp.abs(logits_seq - ref_logits_seq)))
    assert jnp.allclose(h_out, ref_h, atol=5e-3, rtol=5e-3), \
        float(jnp.max(jnp.abs(h_out - ref_h)))

    # Single-step API parity with MultiGRU.forward(x, h).
    logits1, h1 = multigru_forward(packed, x_seq[0], h0, voc_size=VOC)
    jax.block_until_ready((logits1, h1))
    ref_l1, ref_h1 = _ref_forward(raw, x_seq[0], h0)
    assert logits1.shape == (BATCH, VOC) and h1.shape == (LAYERS, BATCH, HID)
    assert jnp.allclose(logits1, ref_l1, atol=5e-3, rtol=5e-3)
    assert jnp.allclose(h1, ref_h1, atol=5e-3, rtol=5e-3)

    print("KERNEL_OK")
</pallas_src>

<mosaic_0001>
module attributes {stable_mosaic.version = 11 : i64} {
  func.func @kernel(%arg0: i32, %arg1: memref<1x16x1xi32, #tpu.memory_space<vmem>>, %arg2: memref<3x16x128xf32, #tpu.memory_space<vmem>>, %arg3: memref<128x128xbf16, #tpu.memory_space<vmem>>, %arg4: memref<3x256x512xbf16, #tpu.memory_space<vmem>>, %arg5: memref<3x1x512xf32, #tpu.memory_space<vmem>>, %arg6: memref<128x128xbf16, #tpu.memory_space<vmem>>, %arg7: memref<1x128xf32, #tpu.memory_space<vmem>>, %arg8: memref<1x16x128xf32, #tpu.memory_space<vmem>>, %arg9: memref<3x16x128xf32, #tpu.memory_space<vmem>>, %arg10: memref<3x16x128xf32, #tpu.memory_space<vmem>>) attributes {dimension_semantics = [#tpu.dimension_semantics<arbitrary>], iteration_bounds = array<i64: 8>, scalar_prefetch = 0 : i64, scratch_operands = 1 : i64, tpu.core_type = #tpu.core_type<tc>, window_params = [{transform_indices = @transform_0, window_bounds = array<i64: 1, 16, 1>}, {pipeline_mode = #tpu.pipeline_mode<synchronous>, transform_indices = @transform_1, window_bounds = array<i64: 3, 16, 128>}, {pipeline_mode = #tpu.pipeline_mode<synchronous>, transform_indices = @transform_2, window_bounds = array<i64: 128, 128>}, {pipeline_mode = #tpu.pipeline_mode<synchronous>, transform_indices = @transform_3, window_bounds = array<i64: 3, 256, 512>}, {pipeline_mode = #tpu.pipeline_mode<synchronous>, transform_indices = @transform_4, window_bounds = array<i64: 3, 1, 512>}, {pipeline_mode = #tpu.pipeline_mode<synchronous>, transform_indices = @transform_5, window_bounds = array<i64: 128, 128>}, {pipeline_mode = #tpu.pipeline_mode<synchronous>, transform_indices = @transform_6, window_bounds = array<i64: 1, 128>}, {transform_indices = @transform_7, window_bounds = array<i64: 1, 16, 128>}, {pipeline_mode = #tpu.pipeline_mode<synchronous>, transform_indices = @transform_8, window_bounds = array<i64: 3, 16, 128>}]} {
    %c0_i32 = arith.constant 0 : i32
    %0 = arith.cmpi eq, %arg0, %c0_i32 : i32
    %1 = arith.extui %0 : i1 to i32
    %c0_i32_0 = arith.constant 0 : i32
    %2 = arith.cmpi ne, %1, %c0_i32_0 : i32
    scf.if %2 {
      %c0_60 = arith.constant 0 : index
      %c0_61 = arith.constant 0 : index
      %c0_62 = arith.constant 0 : index
      %136 = vector.load %arg2[%c0_60, %c0_61, %c0_62] : memref<3x16x128xf32, #tpu.memory_space<vmem>>, vector<3x16x128xf32>
      %c0_63 = arith.constant 0 : index
      %c0_64 = arith.constant 0 : index
      %c0_65 = arith.constant 0 : index
      %137 = vector.load %arg10[%c0_63, %c0_64, %c0_65] : memref<3x16x128xf32, #tpu.memory_space<vmem>>, vector<3x16x128xf32>
      tpu.vector_store %arg10[%c0_63, %c0_64, %c0_65], %136 {strides = array<i32>} : memref<3x16x128xf32, #tpu.memory_space<vmem>>, vector<3x16x128xf32>,
    } else {
    }
    %c0 = arith.constant 0 : index
    %c0_1 = arith.constant 0 : index
    %c0_2 = arith.constant 0 : index
    %3 = vector.load %arg1[%c0, %c0_1, %c0_2] : memref<1x16x1xi32, #tpu.memory_space<vmem>>, vector<1x16x1xi32>
    %4 = vector.shape_cast %3 : vector<1x16x1xi32> to vector<16x1xi32>
    %5 = tpu.iota {dimensions = array<i32: 1>} : vector<16x128xi32>
    %6 = vector.broadcast %4 : vector<16x1xi32> to vector<16x128xi32>
    %7 = arith.cmpi eq, %5, %6 : vector<16x128xi32>
    %8 = arith.extui %7 : vector<16x128xi1> to vector<16x128xi32>
    %9 = arith.sitofp %8 : vector<16x128xi32> to vector<16x128xf32>
    %10 = arith.truncf %9 : vector<16x128xf32> to vector<16x128xbf16>
    %c0_3 = arith.constant 0 : index
    %c0_4 = arith.constant 0 : index
    %11 = vector.load %arg3[%c0_3, %c0_4] : memref<128x128xbf16, #tpu.memory_space<vmem>>, vector<128x128xbf16>
    %cst = arith.constant dense<0.000000e+00> : vector<16x128xf32>
    %12 = tpu.matmul %10, %11, %cst {dimension_numbers = #tpu.dot_dimension_numbers<[1], [0], [0], [1], [0, 0, 1, 1], [], []>} : vector<16x128xbf16>, vector<128x128xbf16>, vector<16x128xf32> -> vector<16x128xf32>
    %c0_5 = arith.constant 0 : index
    %c0_6 = arith.constant 0 : index
    %c0_7 = arith.constant 0 : index
    %13 = vector.load %arg10[%c0_5, %c0_6, %c0_7] : memref<3x16x128xf32, #tpu.memory_space<vmem>>, vector<1x16x128xf32>
    %14 = vector.shape_cast %13 : vector<1x16x128xf32> to vector<16x128xf32>
    %15 = arith.truncf %12 : vector<16x128xf32> to vector<16x128xbf16>
    %16 = arith.truncf %14 : vector<16x128xf32> to vector<16x128xbf16>
    %17 = tpu.concatenate %15, %16 in 1 : vector<16x128xbf16>, vector<16x128xbf16> -> vector<16x256xbf16>
    %c0_8 = arith.constant 0 : index
    %c0_9 = arith.constant 0 : index
    %c0_10 = arith.constant 0 : index
    %18 = vector.load %arg4[%c0_8, %c0_9, %c0_10] : memref<3x256x512xbf16, #tpu.memory_space<vmem>>, vector<1x256x512xbf16>
    %19 = vector.shape_cast %18 : vector<1x256x512xbf16> to vector<256x512xbf16>
    %cst_11 = arith.constant dense<0.000000e+00> : vector<16x512xf32>
    %20 = tpu.matmul %17, %19, %cst_11 {dimension_numbers = #tpu.dot_dimension_numbers<[1], [0], [0], [1], [0, 0, 1, 1], [], []>} : vector<16x256xbf16>, vector<256x512xbf16>, vector<16x512xf32> -> vector<16x512xf32>
    %c0_12 = arith.constant 0 : index
    %c0_13 = arith.constant 0 : index
    %c0_14 = arith.constant 0 : index
    %21 = vector.load %arg5[%c0_12, %c0_13, %c0_14] : memref<3x1x512xf32, #tpu.memory_space<vmem>>, vector<1x1x512xf32>
    %22 = vector.shape_cast %21 : vector<1x1x512xf32> to vector<1x512xf32>
    %23 = vector.broadcast %22 : vector<1x512xf32> to vector<16x512xf32>
    %24 = arith.addf %20, %23 : vector<16x512xf32>
    %25 = vector.extract_strided_slice %24 {offsets = [0, 0], sizes = [16, 128], strides = [1, 1]} : vector<16x512xf32> to vector<16x128xf32>
    %26 = arith.negf %25 : vector<16x128xf32>
    %27 = math.exp %26 : vector<16x128xf32>
    %cst_15 = arith.constant 1.000000e+00 : f32
    %28 = vector.broadcast %cst_15 : f32 to vector<16x128xf32>
    %29 = arith.addf %28, %27 : vector<16x128xf32>
    %30 = arith.divf %28, %29 : vector<16x128xf32>
    %31 = vector.extract_strided_slice %24 {offsets = [0, 128], sizes = [16, 128], strides = [1, 1]} : vector<16x512xf32> to vector<16x128xf32>
    %32 = arith.negf %31 : vector<16x128xf32>
    %33 = math.exp %32 : vector<16x128xf32>
    %cst_16 = arith.constant 1.000000e+00 : f32
    %34 = vector.broadcast %cst_16 : f32 to vector<16x128xf32>
    %35 = arith.addf %34, %33 : vector<16x128xf32>
    %36 = arith.divf %34, %35 : vector<16x128xf32>
    %37 = vector.extract_strided_slice %24 {offsets = [0, 256], sizes = [16, 128], strides = [1, 1]} : vector<16x512xf32> to vector<16x128xf32>
    %38 = vector.extract_strided_slice %24 {offsets = [0, 384], sizes = [16, 128], strides = [1, 1]} : vector<16x512xf32> to vector<16x128xf32>
    %39 = arith.mulf %30, %38 : vector<16x128xf32>
    %40 = arith.addf %37, %39 : vector<16x128xf32>
    %41 = math.tanh %40 : vector<16x128xf32>
    %cst_17 = arith.constant 1.000000e+00 : f32
    %42 = vector.broadcast %cst_17 : f32 to vector<16x128xf32>
    %43 = arith.subf %42, %36 : vector<16x128xf32>
    %44 = arith.mulf %43, %41 : vector<16x128xf32>
    %45 = arith.mulf %36, %14 : vector<16x128xf32>
    %46 = arith.addf %44, %45 : vector<16x128xf32>
    %c0_18 = arith.constant 0 : index
    %c0_19 = arith.constant 0 : index
    %c0_20 = arith.constant 0 : index
    %47 = vector.load %arg10[%c0_18, %c0_19, %c0_20] : memref<3x16x128xf32, #tpu.memory_space<vmem>>, vector<1x16x128xf32>
    %48 = vector.shape_cast %47 : vector<1x16x128xf32> to vector<16x128xf32>
    %49 = vector.shape_cast %46 : vector<16x128xf32> to vector<1x16x128xf32>
    tpu.vector_store %arg10[%c0_18, %c0_19, %c0_20], %49 {strides = array<i32>} : memref<3x16x128xf32, #tpu.memory_space<vmem>>, vector<1x16x128xf32>,
    %c1 = arith.constant 1 : index
    %c0_21 = arith.constant 0 : index
    %c0_22 = arith.constant 0 : index
    %50 = vector.load %arg10[%c1, %c0_21, %c0_22] : memref<3x16x128xf32, #tpu.memory_space<vmem>>, vector<1x16x128xf32>
    %51 = vector.shape_cast %50 : vector<1x16x128xf32> to vector<16x128xf32>
    %52 = arith.truncf %46 : vector<16x128xf32> to vector<16x128xbf16>
    %53 = arith.truncf %51 : vector<16x128xf32> to vector<16x128xbf16>
    %54 = tpu.concatenate %52, %53 in 1 : vector<16x128xbf16>, vector<16x128xbf16> -> vector<16x256xbf16>
    %c1_23 = arith.constant 1 : index
    %c0_24 = arith.constant 0 : index
    %c0_25 = arith.constant 0 : index
    %55 = vector.load %arg4[%c1_23, %c0_24, %c0_25] : memref<3x256x512xbf16, #tpu.memory_space<vmem>>, vector<1x256x512xbf16>
    %56 = vector.shape_cast %55 : vector<1x256x512xbf16> to vector<256x512xbf16>
    %cst_26 = arith.constant dense<0.000000e+00> : vector<16x512xf32>
    %57 = tpu.matmul %54, %56, %cst_26 {dimension_numbers = #tpu.dot_dimension_numbers<[1], [0], [0], [1], [0, 0, 1, 1], [], []>} : vector<16x256xbf16>, vector<256x512xbf16>, vector<16x512xf32> -> vector<16x512xf32>
    %c1_27 = arith.constant 1 : index
    %c0_28 = arith.constant 0 : index
    %c0_29 = arith.constant 0 : index
    %58 = vector.load %arg5[%c1_27, %c0_28, %c0_29] : memref<3x1x512xf32, #tpu.memory_space<vmem>>, vector<1x1x512xf32>
    %59 = vector.shape_cast %58 : vector<1x1x512xf32> to vector<1x512xf32>
    %60 = vector.broadcast %59 : vector<1x512xf32> to vector<16x512xf32>
    %61 = arith.addf %57, %60 : vector<16x512xf32>
    %62 = vector.extract_strided_slice %61 {offsets = [0, 0], sizes = [16, 128], strides = [1, 1]} : vector<16x512xf32> to vector<16x128xf32>
    %63 = arith.negf %62 : vector<16x128xf32>
    %64 = math.exp %63 : vector<16x128xf32>
    %cst_30 = arith.constant 1.000000e+00 : f32
    %65 = vector.broadcast %cst_30 : f32 to vector<16x128xf32>
    %66 = arith.addf %65, %64 : vector<16x128xf32>
    %67 = arith.divf %65, %66 : vector<16x128xf32>
    %68 = vector.extract_strided_slice %61 {offsets = [0, 128], sizes = [16, 128], strides = [1, 1]} : vector<16x512xf32> to vector<16x128xf32>
    %69 = arith.negf %68 : vector<16x128xf32>
    %70 = math.exp %69 : vector<16x128xf32>
    %cst_31 = arith.constant 1.000000e+00 : f32
    %71 = vector.broadcast %cst_31 : f32 to vector<16x128xf32>
    %72 = arith.addf %71, %70 : vector<16x128xf32>
    %73 = arith.divf %71, %72 : vector<16x128xf32>
    %74 = vector.extract_strided_slice %61 {offsets = [0, 256], sizes = [16, 128], strides = [1, 1]} : vector<16x512xf32> to vector<16x128xf32>
    %75 = vector.extract_strided_slice %61 {offsets = [0, 384], sizes = [16, 128], strides = [1, 1]} : vector<16x512xf32> to vector<16x128xf32>
    %76 = arith.mulf %67, %75 : vector<16x128xf32>
    %77 = arith.addf %74, %76 : vector<16x128xf32>
    %78 = math.tanh %77 : vector<16x128xf32>
    %cst_32 = arith.constant 1.000000e+00 : f32
    %79 = vector.broadcast %cst_32 : f32 to vector<16x128xf32>
    %80 = arith.subf %79, %73 : vector<16x128xf32>
    %81 = arith.mulf %80, %78 : vector<16x128xf32>
    %82 = arith.mulf %73, %51 : vector<16x128xf32>
    %83 = arith.addf %81, %82 : vector<16x128xf32>
    %c1_33 = arith.constant 1 : index
    %c0_34 = arith.constant 0 : index
    %c0_35 = arith.constant 0 : index
    %84 = vector.load %arg10[%c1_33, %c0_34, %c0_35] : memref<3x16x128xf32, #tpu.memory_space<vmem>>, vector<1x16x128xf32>
    %85 = vector.shape_cast %84 : vector<1x16x128xf32> to vector<16x128xf32>
    %86 = vector.shape_cast %83 : vector<16x128xf32> to vector<1x16x128xf32>
    tpu.vector_store %arg10[%c1_33, %c0_34, %c0_35], %86 {strides = array<i32>} : memref<3x16x128xf32, #tpu.memory_space<vmem>>, vector<1x16x128xf32>,
    %c2 = arith.constant 2 : index
    %c0_36 = arith.constant 0 : index
    %c0_37 = arith.constant 0 : index
    %87 = vector.load %arg10[%c2, %c0_36, %c0_37] : memref<3x16x128xf32, #tpu.memory_space<vmem>>, vector<1x16x128xf32>
    %88 = vector.shape_cast %87 : vector<1x16x128xf32> to vector<16x128xf32>
    %89 = arith.truncf %83 : vector<16x128xf32> to vector<16x128xbf16>
    %90 = arith.truncf %88 : vector<16x128xf32> to vector<16x128xbf16>
    %91 = tpu.concatenate %89, %90 in 1 : vector<16x128xbf16>, vector<16x128xbf16> -> vector<16x256xbf16>
    %c2_38 = arith.constant 2 : index
    %c0_39 = arith.constant 0 : index
    %c0_40 = arith.constant 0 : index
    %92 = vector.load %arg4[%c2_38, %c0_39, %c0_40] : memref<3x256x512xbf16, #tpu.memory_space<vmem>>, vector<1x256x512xbf16>
    %93 = vector.shape_cast %92 : vector<1x256x512xbf16> to vector<256x512xbf16>
    %cst_41 = arith.constant dense<0.000000e+00> : vector<16x512xf32>
    %94 = tpu.matmul %91, %93, %cst_41 {dimension_numbers = #tpu.dot_dimension_numbers<[1], [0], [0], [1], [0, 0, 1, 1], [], []>} : vector<16x256xbf16>, vector<256x512xbf16>, vector<16x512xf32> -> vector<16x512xf32>
    %c2_42 = arith.constant 2 : index
    %c0_43 = arith.constant 0 : index
    %c0_44 = arith.constant 0 : index
    %95 = vector.load %arg5[%c2_42, %c0_43, %c0_44] : memref<3x1x512xf32, #tpu.memory_space<vmem>>, vector<1x1x512xf32>
    %96 = vector.shape_cast %95 : vector<1x1x512xf32> to vector<1x512xf32>
    %97 = vector.broadcast %96 : vector<1x512xf32> to vector<16x512xf32>
    %98 = arith.addf %94, %97 : vector<16x512xf32>
    %99 = vector.extract_strided_slice %98 {offsets = [0, 0], sizes = [16, 128], strides = [1, 1]} : vector<16x512xf32> to vector<16x128xf32>
    %100 = arith.negf %99 : vector<16x128xf32>
    %101 = math.exp %100 : vector<16x128xf32>
    %cst_45 = arith.constant 1.000000e+00 : f32
    %102 = vector.broadcast %cst_45 : f32 to vector<16x128xf32>
    %103 = arith.addf %102, %101 : vector<16x128xf32>
    %104 = arith.divf %102, %103 : vector<16x128xf32>
    %105 = vector.extract_strided_slice %98 {offsets = [0, 128], sizes = [16, 128], strides = [1, 1]} : vector<16x512xf32> to vector<16x128xf32>
    %106 = arith.negf %105 : vector<16x128xf32>
    %107 = math.exp %106 : vector<16x128xf32>
    %cst_46 = arith.constant 1.000000e+00 : f32
    %108 = vector.broadcast %cst_46 : f32 to vector<16x128xf32>
    %109 = arith.addf %108, %107 : vector<16x128xf32>
    %110 = arith.divf %108, %109 : vector<16x128xf32>
    %111 = vector.extract_strided_slice %98 {offsets = [0, 256], sizes = [16, 128], strides = [1, 1]} : vector<16x512xf32> to vector<16x128xf32>
    %112 = vector.extract_strided_slice %98 {offsets = [0, 384], sizes = [16, 128], strides = [1, 1]} : vector<16x512xf32> to vector<16x128xf32>
    %113 = arith.mulf %104, %112 : vector<16x128xf32>
    %114 = arith.addf %111, %113 : vector<16x128xf32>
    %115 = math.tanh %114 : vector<16x128xf32>
    %cst_47 = arith.constant 1.000000e+00 : f32
    %116 = vector.broadcast %cst_47 : f32 to vector<16x128xf32>
    %117 = arith.subf %116, %110 : vector<16x128xf32>
    %118 = arith.mulf %117, %115 : vector<16x128xf32>
    %119 = arith.mulf %110, %88 : vector<16x128xf32>
    %120 = arith.addf %118, %119 : vector<16x128xf32>
    %c2_48 = arith.constant 2 : index
    %c0_49 = arith.constant 0 : index
    %c0_50 = arith.constant 0 : index
    %121 = vector.load %arg10[%c2_48, %c0_49, %c0_50] : memref<3x16x128xf32, #tpu.memory_space<vmem>>, vector<1x16x128xf32>
    %122 = vector.shape_cast %121 : vector<1x16x128xf32> to vector<16x128xf32>
    %123 = vector.shape_cast %120 : vector<16x128xf32> to vector<1x16x128xf32>
    tpu.vector_store %arg10[%c2_48, %c0_49, %c0_50], %123 {strides = array<i32>} : memref<3x16x128xf32, #tpu.memory_space<vmem>>, vector<1x16x128xf32>,
    %124 = arith.truncf %120 : vector<16x128xf32> to vector<16x128xbf16>
    %c0_51 = arith.constant 0 : index
    %c0_52 = arith.constant 0 : index
    %125 = vector.load %arg6[%c0_51, %c0_52] : memref<128x128xbf16, #tpu.memory_space<vmem>>, vector<128x128xbf16>
    %cst_53 = arith.constant dense<0.000000e+00> : vector<16x128xf32>
    %126 = tpu.matmul %124, %125, %cst_53 {dimension_numbers = #tpu.dot_dimension_numbers<[1], [0], [0], [1], [0, 0, 1, 1], [], []>} : vector<16x128xbf16>, vector<128x128xbf16>, vector<16x128xf32> -> vector<16x128xf32>
    %c0_54 = arith.constant 0 : index
    %c0_55 = arith.constant 0 : index
    %127 = vector.load %arg7[%c0_54, %c0_55] : memref<1x128xf32, #tpu.memory_space<vmem>>, vector<1x128xf32>
    %128 = vector.broadcast %127 : vector<1x128xf32> to vector<16x128xf32>
    %129 = arith.addf %126, %128 : vector<16x128xf32>
    %c0_56 = arith.constant 0 : index
    %c0_57 = arith.constant 0 : index
    %c0_58 = arith.constant 0 : index
    %130 = vector.load %arg8[%c0_56, %c0_57, %c0_58] : memref<1x16x128xf32, #tpu.memory_space<vmem>>, vector<1x16x128xf32>
    %131 = vector.shape_cast %130 : vector<1x16x128xf32> to vector<16x128xf32>
    %132 = vector.shape_cast %129 : vector<16x128xf32> to vector<1x16x128xf32>
    tpu.vector_store %arg8[%c0_56, %c0_57, %c0_58], %132 {strides = array<i32>} : memref<1x16x128xf32, #tpu.memory_space<vmem>>, vector<1x16x128xf32>,
    %c7_i32 = arith.constant 7 : i32
    %133 = arith.cmpi eq, %arg0, %c7_i32 : i32
    %134 = arith.extui %133 : i1 to i32
    %c0_i32_59 = arith.constant 0 : i32
    %135 = arith.cmpi ne, %134, %c0_i32_59 : i32
    scf.if %135 {
      %c0_60 = arith.constant 0 : index
      %c0_61 = arith.constant 0 : index
      %c0_62 = arith.constant 0 : index
      %136 = vector.load %arg10[%c0_60, %c0_61, %c0_62] : memref<3x16x128xf32, #tpu.memory_space<vmem>>, vector<3x16x128xf32>
      %c0_63 = arith.constant 0 : index
      %c0_64 = arith.constant 0 : index
      %c0_65 = arith.constant 0 : index
      %137 = vector.load %arg9[%c0_63, %c0_64, %c0_65] : memref<3x16x128xf32, #tpu.memory_space<vmem>>, vector<3x16x128xf32>
      tpu.vector_store %arg9[%c0_63, %c0_64, %c0_65], %136 {strides = array<i32>} : memref<3x16x128xf32, #tpu.memory_space<vmem>>, vector<3x16x128xf32>,
    } else {
    }
    return
  }
  func.func @transform_0(%arg0: i32) -> (i32, i32, i32) {
    %c0_i32 = arith.constant 0 : i32
    %c0_i32_0 = arith.constant 0 : i32
    %c0_i32_1 = arith.constant 0 : i32
    return %arg0, %c0_i32, %c0_i32_0 : i32, i32, i32
  }
  func.func @transform_1(%arg0: i32) -> (i32, i32, i32) {
    %c0_i32 = arith.constant 0 : i32
    %c0_i32_0 = arith.constant 0 : i32
    %c0_i32_1 = arith.constant 0 : i32
    %c0_i32_2 = arith.constant 0 : i32
    return %c0_i32, %c0_i32_0, %c0_i32_1 : i32, i32, i32
  }
  func.func @transform_2(%arg0: i32) -> (i32, i32) {
    %c0_i32 = arith.constant 0 : i32
    %c0_i32_0 = arith.constant 0 : i32
    %c0_i32_1 = arith.constant 0 : i32
    return %c0_i32, %c0_i32_0 : i32, i32
  }
  func.func @transform_3(%arg0: i32) -> (i32, i32, i32) {
    %c0_i32 = arith.constant 0 : i32
    %c0_i32_0 = arith.constant 0 : i32
    %c0_i32_1 = arith.constant 0 : i32
    %c0_i32_2 = arith.constant 0 : i32
    return %c0_i32, %c0_i32_0, %c0_i32_1 : i32, i32, i32
  }
  func.func @transform_4(%arg0: i32) -> (i32, i32, i32) {
    %c0_i32 = arith.constant 0 : i32
    %c0_i32_0 = arith.constant 0 : i32
    %c0_i32_1 = arith.constant 0 : i32
    %c0_i32_2 = arith.constant 0 : i32
    return %c0_i32, %c0_i32_0, %c0_i32_1 : i32, i32, i32
  }
  func.func @transform_5(%arg0: i32) -> (i32, i32) {
    %c0_i32 = arith.constant 0 : i32
    %c0_i32_0 = arith.constant 0 : i32
    %c0_i32_1 = arith.constant 0 : i32
    return %c0_i32, %c0_i32_0 : i32, i32
  }
  func.func @transform_6(%arg0: i32) -> (i32, i32) {
    %c0_i32 = arith.constant 0 : i32
    %c0_i32_0 = arith.constant 0 : i32
    %c0_i32_1 = arith.constant 0 : i32
    return %c0_i32, %c0_i32_0 : i32, i32
  }
  func.func @transform_7(%arg0: i32) -> (i32, i32, i32) {
    %c0_i32 = arith.constant 0 : i32
    %c0_i32_0 = arith.constant 0 : i32
    %c0_i32_1 = arith.constant 0 : i32
    return %arg0, %c0_i32, %c0_i32_0 : i32, i32, i32
  }
  func.func @transform_8(%arg0: i32) -> (i32, i32, i32) {
    %c0_i32 = arith.constant 0 : i32
    %c0_i32_0 = arith.constant 0 : i32
    %c0_i32_1 = arith.constant 0 : i32
    %c0_i32_2 = arith.constant 0 : i32
    return %c0_i32, %c0_i32_0, %c0_i32_1 : i32, i32, i32
  }
}

</mosaic_0001>

<bundles_post_ra>
// kernel: multigru_forward_seq.1
= control target key start
LH: loop header
LB: loop body
LE: loop exit
PB: predicated region body
PF: predicated region fallthrough
CT: control target
= control target key end

     0   :  { %14 = vsyncpa [#allocation4], 0  ;;  %s3515_s0 = inlined_call_operand.vmem [shape: s32[8,16,1], index: 0, kind: input, shape index: {}]   ;;  %s3516_s1 = inlined_call_operand.vmem [shape: f32[3,16,128], index: 1, kind: input, shape index: {}]   ;;  %s3517_s2 = inlined_call_operand.vmem [shape: bf16[128,128], index: 2, kind: input, shape index: {}]   ;;  %s3518_s3 = inlined_call_operand.hbm [shape: bf16[3,256,512], index: 3, kind: input, shape index: {}]   ;;  %s3519_s4 = inlined_call_operand.vmem [shape: f32[3,1,512], index: 4, kind: input, shape index: {}]   ;;  %s3520_s5 = inlined_call_operand.vmem [shape: bf16[128,128], index: 5, kind: input, shape index: {}]   ;;  %s3521_s6 = inlined_call_operand.vmem [shape: f32[1,128], index: 6, kind: input, shape index: {}]   ;;  %s3522_s7 = inlined_call_operand.hbm [shape: f32[8,16,128], index: 7, kind: output, shape index: {0}]   ;;  %s3523_s8 = inlined_call_operand.hbm [shape: f32[3,16,128], index: 8, kind: output, shape index: {1}]  }
   0x1   :  { %15 = vsyncpa [#allocation5], 0 }
   0x2   :  { %17 = vsyncpa [#allocation5 + $0x1], 0 }
   0x3   :  { %18 = vsyncpa [#allocation8], 0  ;;  %s3225_s27 = smov 0   ;;  %s3227_s28 = smov 0  }
   0x4   :  { %s3229_s29 = smov 0   ;;  %s3231_s30 = smov 0  }
   0x5 LB: > { %s3246_s9 = sadd.s32 4294967295, %s3167_s30   ;;  %s2314_s10 = sadd.s32 4294967294, %s3167_s30   ;;  %s3167_s30 = sphi %s3231_s30, %s3539_s30   ;;  %s3163_s29 = sphi %s3229_s29, %s3538_s29   ;;  %s3159_s28 = sphi %s3227_s28, %s3537_s28   ;;  %s3155_s27 = sphi %s3225_s27, %s3536_s27  }
   0x6   : > { %s3250_s11 = sadd.s32 1, %s3167_s30   ;;  %s183_s12 = sadd.s32 1, %s3163_s29 }
   0x7   : > { %s180_s13 = ssub.s32 %s3167_s30, %s3250_s11  ;;  %p193_p0 = scmp.ne.s32.totalorder %s3163_s29, %s3159_s28 }
   0x8   : > { %p181_p1 = scmp.eq.s32.totalorder %s180_s13, 0  ;;  %p3524_p2 = scmp.eq.s32.totalorder %s3246_s9, 7 }
   0x9   : > { %p199_p3 = scmp.ne.s32.totalorder %s3159_s28, %s3155_s27  ;;  %p200_p4 = scmp.eq.s32.totalorder %s2314_s10, 7 }
   0xa   : > { %s3261_s14 = scalar_select %p181_p1, %s3163_s29, %s183_s12  }
   0xb   : > { %p3265_p5 = por %p3524_p2, %p193_p0  ;;  %p3269_p6 = por %p200_p4, %p199_p3 }
   0xc   : > { %p2315_p7 = scmp.ge.s32.totalorder %s3167_s30, 1  ;;  %p228_p8 = scmp.lt.s32.totalorder %s3167_s30, 9 }
   0xd   : > { %s3527_s16 = scalar_select %p3269_p6, 1, 0 }
   0xe   : > { %p2637_p10 = scmp.eq.s32.totalorder %s3246_s9, 0  ;;  %p3277_p11 = pnand %p2315_p7, %p228_p8 }
   0xf   : > { %s3169_s18 = smov [#allocation3]  }
  0x10   : > { %s246_s19 = sshll.u32 %s3169_s18, 4  ;;  %p2629_p12 = pneg %p3277_p11  ;;  %s247_s19 = int_to_ptr.vmem [resolvable:$true] %s246_s19 }
  0x11   : > { %s3060_s20 = scalar_lea.vmem %s247_s19, 24576  ;;  %p3068_p2 = scmp.lt.s32.totalorder %s247_s19, %s247_s19 }
  0x12   : > { %p2630_p13 = pnand %p2637_p10, %p2629_p12  ;;  %p3061_p1 = scmp.ne.s32.totalorder %s247_s19, %s3060_s20 }
  0x13   : > { %p3069_p9 = scmp.lt.s32.totalorder %s3060_s20, %s3060_s20 }
  0x14   : > { %p3051_p0 = pneg %p2630_p13 }
  0x15   : > { %p3070_p6 = por %p3069_p9, %p3068_p2 }
  0x16   : > { %p3063_p3 = pnand %p3061_p1, %p3051_p0 }
  0x18   : > { %p3064_p4 = pneg %p3063_p3 }
  0x1a   : > { %p3071_p7 = pnand %p3070_p6, %p3064_p4 }
  0x1c   : > { %3074 = shalt.err (!%p3071_p7)
}
  0x1d   : > { %s3170_s21 = smov 256   ;;  %s3171_s22 = smov 16  }
  0x1e   : > { %2632 = dma.hbm_to_vmem [thread:$0]  (!%p2630_p13), %s3518_s3, 24576, %s247_s19, [#allocation4], %s3170_s21, %s3170_s21, %s3171_s22  }
  0x1f   : > { %279 = sbr.rel (%p3277_p11) target bundleno = 1394 (0x572), region = 48 }
  0x24   : > { %3142 = dma.done.wait (%p2637_p10), [#allocation4], 24576  }
  0x25   : > { %3144 = vsyncadd (%p2637_p10), [#allocation4], 4294942720  ;;  %s3525_s25 = sand.u32 1, %s3159_s28   ;;  %p313_p2 = scmp.lt.s32.totalorder %s3246_s9, 7 }
  0x26   : > { %s2320_s26 = sshll.u32 %s3525_s25, 4  ;;  %p3529_p6 = scmp.ne.s32.totalorder %s3246_s9, 0 }
  0x27   : > { %s314_s10 = scalar_select %p313_p2, %s3246_s9, 7 }
  0x28   : > { %s3302_s19 = scalar_lea.vmem [#allocation6], %s2320_s26  ;;  %322 = sbr.rel (%p3529_p6) target bundleno = 49 (0x31), region = 56 }
  0x29   : > { %s2559_s12 = sshll.u32 %s314_s10, 4 }
  0x2a   : > { %s317_s17 = scalar_lea.vmem %s3515_s0, %s2559_s12 }
  0x2d   : > { %v323_v0 = vld [vmem:[%s3516_s1] sm:$0xff]  ;;  %v324_v1 = vld [vmem:[%s3516_s1 + $0x8] sm:$0xff]  ;;  %v325_v2 = vld [vmem:[%s3516_s1 + $0x10] sm:$0xff] }
  0x2e   : > { %329 = vst [vmem:[#allocation2 + $0x28] sm:$0xff] %v323_v0  ;;  %330 = vst [vmem:[#allocation2 + $0x10] sm:$0xff] %v324_v1  ;;  %v326_v3 = vld [vmem:[%s3516_s1 + $0x18] sm:$0xff]  ;;  %v327_v4 = vld [vmem:[%s3516_s1 + $0x20] sm:$0xff] }
  0x2f   : > { %331 = vst [vmem:[#allocation2 + $0x8] sm:$0xff] %v325_v2  ;;  %v328_v5 = vld [vmem:[%s3516_s1 + $0x28] sm:$0xff]  ;;  %332 = vst [vmem:[#allocation2] sm:$0xff] %v326_v3 }
  0x30   : > { %333 = vst [vmem:[#allocation2 + $0x18] sm:$0xff] %v327_v4  ;;  %334 = vst [vmem:[#allocation2 + $0x20] sm:$0xff] %v328_v5 }
  0x31 PF: > { %v335_v6 = vld [vmem:[%s317_s17] sm:$0xff]  ;;  %v3172_v7 = vmov 0   ;;  %v3173_v8 = vmov 0.0   ;;  %v2685_v9 = vld [vmem:[%s3517_s2 + $0x38] sm:$0xff]   ;;  %v336_v10 = vld [vmem:[%s317_s17 + $0x8] sm:$0xff]  ;;  %vm3174_vm0 = vmmov 0   ;;  %v337_v48 = vlaneseq }
  0x32   : > { %2684 = vset.pattern.permute.xlu0 %v3172_v7  ;;  %2579 = vmatprep.subr.bf16.mxu0 %v3173_v8  ;;  %v2686_v11 = vld [vmem:[%s3517_s2 + $0x30] sm:$0xff]   ;;  %v2687_v12 = vld [vmem:[%s3517_s2 + $0x28] sm:$0xff]   ;;  %v2688_v14 = vld [vmem:[%s3517_s2 + $0x20] sm:$0xff]   ;;  %v3175_v54 = vmov 1.0|1.0   ;;  %p2551_p8 = scmp.ne.s32.totalorder %s3246_s9, 7 }
  0x33   : > { %340 = vperm.xlu0 %2684, %v335_v6   ;;  %2580 = vmatpush3.bf16.msra.mxu0 %v2685_v9  ;;  %v2693_v13 = vld [vmem:[#allocation3 + $0xe4] ss:$16 sps:$4 sm:$0xff]   ;;  %v2698_v15 = vld [vmem:[#allocation3 + $0xe0] ss:$16 sps:$4 sm:$0xff]   ;;  %v2689_v19 = vld [vmem:[%s3517_s2 + $0x18] sm:$0xff]   ;;  %v338_v50 = vand.u32 127, %v337_v48 }
  0x34   : > { %2581 = vmatprep.subr.bf16.mxu0 %v3173_v8  ;;  %2595 = vmatprep.mubr.msk.bf16.mxu0 %vm3174_vm0, %v3173_v8  ;;  %v2699_v16 = vld [vmem:[#allocation3 + $0xc4] ss:$16 sps:$4 sm:$0xff]   ;;  %v2704_v17 = vld [vmem:[#allocation3 + $0xc0] ss:$16 sps:$4 sm:$0xff]   ;;  %v2691_v25 = vld [vmem:[%s3517_s2 + $0x8] sm:$0xff]  }
  0x35   : > { %867 = vmatprep.subr.bf16.mxu1 %v2693_v13  ;;  %v2705_v18 = vld [vmem:[#allocation3 + $0xa4] ss:$16 sps:$4 sm:$0xff]   ;;  %v2710_v20 = vld [vmem:[#allocation3 + $0xa0] ss:$16 sps:$4 sm:$0xff]   ;;  %v2697_v29 = vld [vmem:[#allocation3 + $0xec] ss:$16 sps:$4 sm:$0xff]  }
  0x36   : > { %868 = vmatpush1.bf16.msra.mxu1 %v2698_v15  ;;  %v2711_v21 = vld [vmem:[#allocation3 + $0x84] ss:$16 sps:$4 sm:$0xff]   ;;  %v2716_v23 = vld [vmem:[#allocation3 + $0x80] ss:$16 sps:$4 sm:$0xff]   ;;  %v2695_v52 = vld [vmem:[#allocation3 + $0xe8] ss:$16 sps:$4 sm:$0xff]  }
  0x37   : > { %343 = vperm.xlu0 %2684, %v336_v10   ;;  %2582 = vmatpush3.bf16.msra.mxu0 %v2686_v11  ;;  %v2690_v22 = vld [vmem:[%s3517_s2 + $0x10] sm:$0xff]   ;;  %v2692_v27 = vld [vmem:[%s3517_s2] sm:$0xff]   ;;  %v2703_v53 = vld [vmem:[#allocation3 + $0xcc] ss:$16 sps:$4 sm:$0xff]  }
  0x38   : > { %2583 = vmatprep.subr.bf16.mxu0 %v3173_v8  ;;  %869 = vmatprep.subr.bf16.mxu1 %v2699_v16  ;;  %v2717_v24 = vld [vmem:[#allocation3 + $0x64] ss:$16 sps:$4 sm:$0xff]   ;;  %v2722_v26 = vld [vmem:[#allocation3 + $0x60] ss:$16 sps:$4 sm:$0xff]   ;;  %v2701_v55 = vld [vmem:[#allocation3 + $0xc8] ss:$16 sps:$4 sm:$0xff]  }
  0x39   : > { %v2723_v28 = vld [vmem:[#allocation3 + $0x44] ss:$16 sps:$4 sm:$0xff]   ;;  %v2728_v30 = vld [vmem:[#allocation3 + $0x40] ss:$16 sps:$4 sm:$0xff]   ;;  %v2709_v56 = vld [vmem:[#allocation3 + $0xac] ss:$16 sps:$4 sm:$0xff]  }
  0x3a   : > { %870 = vmatpush1.bf16.msra.mxu1 %v2704_v17  ;;  %v2729_v31 = vld [vmem:[#allocation3 + $0x24] ss:$16 sps:$4 sm:$0xff]   ;;  %v2734_v32 = vld [vmem:[#allocation3 + $0x20] ss:$16 sps:$4 sm:$0xff]   ;;  %v2707_v57 = vld [vmem:[#allocation3 + $0xa8] ss:$16 sps:$4 sm:$0xff]  }
  0x3b   : > { %2584 = vmatpush3.bf16.msra.mxu0 %v2687_v12  ;;  %871 = vmatprep.subr.bf16.mxu1 %v2705_v18  ;;  %v2735_v33 = vld [vmem:[#allocation3 + $0x4] ss:$16 sps:$4 sm:$0xff]   ;;  %v2740_v34 = vld [vmem:[#allocation3] ss:$16 sps:$4 sm:$0xff]   ;;  %v2715_v58 = vld [vmem:[#allocation3 + $0x8c] ss:$16 sps:$4 sm:$0xff]  }
  0x3c   : > { %2585 = vmatprep.subr.bf16.mxu0 %v3173_v8  ;;  %v2741_v35 = vld [vmem:[#allocation3 + $0x1e4] ss:$16 sps:$4 sm:$0xff]   ;;  %v2746_v36 = vld [vmem:[#allocation3 + $0x1e0] ss:$16 sps:$4 sm:$0xff]   ;;  %v2713_v59 = vld [vmem:[#allocation3 + $0x88] ss:$16 sps:$4 sm:$0xff]  }
  0x3d   : > { %v2747_v37 = vld [vmem:[#allocation3 + $0x1c4] ss:$16 sps:$4 sm:$0xff]   ;;  %v2752_v38 = vld [vmem:[#allocation3 + $0x1c0] ss:$16 sps:$4 sm:$0xff]   ;;  %v2721_v60 = vld [vmem:[#allocation3 + $0x6c] ss:$16 sps:$4 sm:$0xff]  }
  0x3e   : > { %872 = vmatpush1.bf16.msra.mxu1 %v2710_v20  ;;  %v2753_v39 = vld [vmem:[#allocation3 + $0x1a4] ss:$16 sps:$4 sm:$0xff]   ;;  %v2758_v40 = vld [vmem:[#allocation3 + $0x1a0] ss:$16 sps:$4 sm:$0xff]   ;;  %v2719_v61 = vld [vmem:[#allocation3 + $0x68] ss:$16 sps:$4 sm:$0xff]  }
  0x3f   : > { %2586 = vmatpush3.bf16.msra.mxu0 %v2688_v14  ;;  %873 = vmatprep.subr.bf16.mxu1 %v2711_v21  ;;  %v2759_v41 = vld [vmem:[#allocation3 + $0x184] ss:$16 sps:$4 sm:$0xff]   ;;  %v2764_v42 = vld [vmem:[#allocation3 + $0x180] ss:$16 sps:$4 sm:$0xff]   ;;  %v2727_v62 = vld [vmem:[#allocation3 + $0x4c] ss:$16 sps:$4 sm:$0xff]  }
  0x40   : > { %2587 = vmatprep.subr.bf16.mxu0 %v3173_v8  ;;  %v2765_v43 = vld [vmem:[#allocation3 + $0x164] ss:$16 sps:$4 sm:$0xff]   ;;  %v2770_v44 = vld [vmem:[#allocation3 + $0x160] ss:$16 sps:$4 sm:$0xff]   ;;  %v2725_v63 = vld [vmem:[#allocation3 + $0x48] ss:$16 sps:$4 sm:$0xff]  }
  0x41   : > { %v2771_v45 = vld [vmem:[#allocation3 + $0x144] ss:$16 sps:$4 sm:$0xff]   ;;  %v2776_v46 = vld [vmem:[#allocation3 + $0x140] ss:$16 sps:$4 sm:$0xff]   ;;  %v2733_v0 = vld [vmem:[#allocation3 + $0x2c] ss:$16 sps:$4 sm:$0xff]  }
  0x42   : > { %874 = vmatpush1.bf16.msra.mxu1 %v2716_v23  ;;  %v2777_v47 = vld [vmem:[#allocation3 + $0x124] ss:$16 sps:$4 sm:$0xff]   ;;  %v2731_v1 = vld [vmem:[#allocation3 + $0x28] ss:$16 sps:$4 sm:$0xff]   ;;  %v2739_v2 = vld [vmem:[#allocation3 + $0xc] ss:$16 sps:$4 sm:$0xff]  }
  0x43   : > { %2588 = vmatpush3.bf16.msra.mxu0 %v2689_v19  ;;  %875 = vmatprep.subr.bf16.mxu1 %v2717_v24  ;;  %v2737_v3 = vld [vmem:[#allocation3 + $0x8] ss:$16 sps:$4 sm:$0xff]   ;;  %v2745_v4 = vld [vmem:[#allocation3 + $0x1ec] ss:$16 sps:$4 sm:$0xff]   ;;  %v2782_v19 = vld [vmem:[#allocation3 + $0x120] ss:$16 sps:$4 sm:$0xff]  }
  0x44   : > { %2589 = vmatprep.subr.bf16.mxu0 %v3173_v8  ;;  %v2743_v5 = vld [vmem:[#allocation3 + $0x1e8] ss:$16 sps:$4 sm:$0xff]   ;;  %v2751_v6 = vld [vmem:[#allocation3 + $0x1cc] ss:$16 sps:$4 sm:$0xff]   ;;  %v2783_v20 = vld [vmem:[#allocation3 + $0x104] ss:$16 sps:$4 sm:$0xff]  }
  0x45   : > { %v2749_v7 = vld [vmem:[#allocation3 + $0x1c8] ss:$16 sps:$4 sm:$0xff]   ;;  %v2757_v9 = vld [vmem:[#allocation3 + $0x1ac] ss:$16 sps:$4 sm:$0xff]   ;;  %v2788_v23 = vld [vmem:[#allocation3 + $0x100] ss:$16 sps:$4 sm:$0xff]  }
  0x46   : > { %876 = vmatpush1.bf16.msra.mxu1 %v2722_v26  ;;  %v2755_v10 = vld [vmem:[#allocation3 + $0x1a8] ss:$16 sps:$4 sm:$0xff]   ;;  %v2763_v11 = vld [vmem:[#allocation3 + $0x18c] ss:$16 sps:$4 sm:$0xff]  }
  0x47   : > { %2590 = vmatpush3.bf16.msra.mxu0 %v2690_v22  ;;  %877 = vmatprep.subr.bf16.mxu1 %v2723_v28  ;;  %v2761_v12 = vld [vmem:[#allocation3 + $0x188] ss:$16 sps:$4 sm:$0xff]   ;;  %v2769_v13 = vld [vmem:[#allocation3 + $0x16c] ss:$16 sps:$4 sm:$0xff]  }
  0x48   : > { %2591 = vmatprep.subr.bf16.mxu0 %v3173_v8  ;;  %v2767_v14 = vld [vmem:[#allocation3 + $0x168] ss:$16 sps:$4 sm:$0xff]   ;;  %v2775_v15 = vld [vmem:[#allocation3 + $0x14c] ss:$16 sps:$4 sm:$0xff]  }
  0x49   : > { %v2773_v16 = vld [vmem:[#allocation3 + $0x148] ss:$16 sps:$4 sm:$0xff]   ;;  %v2781_v17 = vld [vmem:[#allocation3 + $0x12c] ss:$16 sps:$4 sm:$0xff]  }
  0x4a   : > { %878 = vmatpush1.bf16.msra.mxu1 %v2728_v30  ;;  %v2779_v18 = vld [vmem:[#allocation3 + $0x128] ss:$16 sps:$4 sm:$0xff]   ;;  %v2787_v21 = vld [vmem:[#allocation3 + $0x10c] ss:$16 sps:$4 sm:$0xff]  }
  0x4b   : > { %2592 = vmatpush3.bf16.msra.mxu0 %v2691_v25  ;;  %879 = vmatprep.subr.bf16.mxu1 %v2729_v31  ;;  %v2785_v22 = vld [vmem:[#allocation3 + $0x108] ss:$16 sps:$4 sm:$0xff]   ;;  %v3361_v25 = vld [vmem:[#allocation2 + $0x10] sm:$0xff]  ;;  %v2794_v28 = vld [vmem:[#allocation3 + $0x2ec] ss:$16 sps:$4 sm:$0xff]  }
  0x4c   : > { %2593 = vmatprep.subr.bf16.mxu0 %v3173_v8  ;;  %v3359_v24 = vld [vmem:[#allocation2 + $0x28] sm:$0xff] }
  0x4d   : > { %v460_v26 = vpack.c.bf16 %v3361_v25, %v3359_v24 }
  0x4e   : > { %880 = vmatpush1.bf16.msra.mxu1 %v2734_v32  ;;  %v2789_v32 = vld [vmem:[#allocation3 + $0x2e0] ss:$16 sps:$4 sm:$0xff]  }
  0x4f   : > { %2594 = vmatpush3.bf16.msra.mxu0 %v2692_v27  ;;  %881 = vmatprep.subr.bf16.mxu1 %v2735_v33  ;;  %v2791_v27 = vld [vmem:[#allocation3 + $0x2e4] ss:$16 sps:$4 sm:$0xff]   ;;  %v2792_v33 = vld [vmem:[#allocation3 + $0x2e8] ss:$16 sps:$4 sm:$0xff]  }
  0x50   : > { %910 = vmatprep.subr.bf16.mxu0 %v2697_v29  ;;  %899 = vmatprep.mubr.bf16.mxu1 %v460_v26 }
  0x52   : > { %882 = vmatpush1.bf16.msra.mxu1 %v2740_v34 }
  0x53   : > { %883 = vmatprep.subr.bf16.mxu1 %v2741_v35 }
  0x56   : > { %884 = vmatpush2.bf16.msra.mxu1 %v2746_v36  ;;  %v2797_v36 = vld [vmem:[#allocation3 + $0x2c4] ss:$16 sps:$4 sm:$0xff]  }
  0x57   : > { %885 = vmatprep.subr.bf16.mxu1 %v2747_v37  ;;  %v2800_v37 = vld [vmem:[#allocation3 + $0x2cc] ss:$16 sps:$4 sm:$0xff]  }
  0x5a   : > { %886 = vmatpush2.bf16.msra.mxu1 %v2752_v38  ;;  %v2795_v38 = vld [vmem:[#allocation3 + $0x2c0] ss:$16 sps:$4 sm:$0xff]  }
  0x5b   : > { %887 = vmatprep.subr.bf16.mxu1 %v2753_v39  ;;  %v2798_v39 = vld [vmem:[#allocation3 + $0x2c8] ss:$16 sps:$4 sm:$0xff]  }
  0x5e   : > { %888 = vmatpush2.bf16.msra.mxu1 %v2758_v40  ;;  %v2803_v40 = vld [vmem:[#allocation3 + $0x2a4] ss:$16 sps:$4 sm:$0xff]  }
  0x5f   : > { %889 = vmatprep.subr.bf16.mxu1 %v2759_v41  ;;  %v2806_v41 = vld [vmem:[#allocation3 + $0x2ac] ss:$16 sps:$4 sm:$0xff]  }
  0x62   : > { %890 = vmatpush2.bf16.msra.mxu1 %v2764_v42  ;;  %v2801_v42 = vld [vmem:[#allocation3 + $0x2a0] ss:$16 sps:$4 sm:$0xff]  }
  0x63   : > { %891 = vmatprep.subr.bf16.mxu1 %v2765_v43  ;;  %v2804_v43 = vld [vmem:[#allocation3 + $0x2a8] ss:$16 sps:$4 sm:$0xff]  }
  0x66   : > { %892 = vmatpush2.bf16.msra.mxu1 %v2770_v44  ;;  %v2809_v44 = vld [vmem:[#allocation3 + $0x284] ss:$16 sps:$4 sm:$0xff]  }
  0x67   : > { %893 = vmatprep.subr.bf16.mxu1 %v2771_v45  ;;  %v2812_v45 = vld [vmem:[#allocation3 + $0x28c] ss:$16 sps:$4 sm:$0xff]  }
  0x6a   : > { %894 = vmatpush2.bf16.msra.mxu1 %v2776_v46  ;;  %v2807_v46 = vld [vmem:[#allocation3 + $0x280] ss:$16 sps:$4 sm:$0xff]  }
  0x6b   : > { %895 = vmatprep.subr.bf16.mxu1 %v2777_v47  ;;  %v2810_v47 = vld [vmem:[#allocation3 + $0x288] ss:$16 sps:$4 sm:$0xff]  }
  0x6e   : > { %896 = vmatpush2.bf16.msra.mxu1 %v2782_v19  ;;  %v2861_v19 = vld [vmem:[#allocation3 + $0x360] ss:$16 sps:$4 sm:$0xff]  }
  0x6f   : > { %897 = vmatprep.subr.bf16.mxu1 %v2783_v20  ;;  %v2864_v20 = vld [vmem:[#allocation3 + $0x368] ss:$16 sps:$4 sm:$0xff]  }
  0x72   : > { %898 = vmatpush2.bf16.msra.mxu1 %v2788_v23  ;;  %v2872_v23 = vld [vmem:[#allocation3 + $0x34c] ss:$16 sps:$4 sm:$0xff]  }
  0x73   : > { %1406 = vmatprep.subr.bf16.mxu1 %v2791_v27  ;;  %v2870_v27 = vld [vmem:[#allocation3 + $0x348] ss:$16 sps:$4 sm:$0xff]  }
  0xae   : > { %v341_v49 = vpop.permute.xlu0 %340 }
  0xaf   : > { %vm345_vm1 = vcmp.eq.s32.totalorder %v338_v50, %v341_v49  ;;  %v2815_v49 = vld [vmem:[#allocation3 + $0x264] ss:$16 sps:$4 sm:$0xff]  }
  0xb2   : > { %v344_v51 = vpop.permute.xlu0 %343 }
  0xb3   : > { %vm346_vm2 = vcmp.eq.s32.totalorder %v338_v50, %v344_v51  ;;  %v2818_v50 = vld [vmem:[#allocation3 + $0x26c] ss:$16 sps:$4 sm:$0xff]   ;;  %v2813_v51 = vld [vmem:[#allocation3 + $0x260] ss:$16 sps:$4 sm:$0xff]  }
  0xb4   : > { %vm2334_vm3 = vmpackc.low %vm346_vm2, %vm345_vm1 }
  0xb5   : > { %2596 = vmatmul.mubr.msk.bf16.vlgmr.msra.gmra.mxu0 %vm2334_vm3, %v3175_v54  ;;  %v2824_v54 = vld [vmem:[#allocation3 + $0x24c] ss:$16 sps:$4 sm:$0xff]  }
  0xb6   : > { %911 = vmatpush1.bf16.msra.mxu0 %v2695_v52  ;;  %942 = vmatprep.mubr.bf16.mxu0 %v460_v26  ;;  %v2816_v52 = vld [vmem:[#allocation3 + $0x268] ss:$16 sps:$4 sm:$0xff]   ;;  %v2867_v26 = vld [vmem:[#allocation3 + $0x340] ss:$16 sps:$4 sm:$0xff]  }
  0xb7   : > { %912 = vmatprep.subr.bf16.mxu0 %v2703_v53  ;;  %v2821_v53 = vld [vmem:[#allocation3 + $0x244] ss:$16 sps:$4 sm:$0xff]  }
  0xba   : > { %913 = vmatpush1.bf16.msra.mxu0 %v2701_v55  ;;  %v2819_v55 = vld [vmem:[#allocation3 + $0x240] ss:$16 sps:$4 sm:$0xff]  }
  0xbb   : > { %914 = vmatprep.subr.bf16.mxu0 %v2709_v56  ;;  %v2822_v56 = vld [vmem:[#allocation3 + $0x248] ss:$16 sps:$4 sm:$0xff]  }
  0xbe   : > { %915 = vmatpush1.bf16.msra.mxu0 %v2707_v57  ;;  %v2827_v57 = vld [vmem:[#allocation3 + $0x224] ss:$16 sps:$4 sm:$0xff]  }
  0xbf   : > { %916 = vmatprep.subr.bf16.mxu0 %v2715_v58  ;;  %v2830_v58 = vld [vmem:[#allocation3 + $0x22c] ss:$16 sps:$4 sm:$0xff]  }
  0xc2   : > { %917 = vmatpush1.bf16.msra.mxu0 %v2713_v59  ;;  %v2825_v59 = vld [vmem:[#allocation3 + $0x220] ss:$16 sps:$4 sm:$0xff]  }
  0xc3   : > { %918 = vmatprep.subr.bf16.mxu0 %v2721_v60  ;;  %v2828_v60 = vld [vmem:[#allocation3 + $0x228] ss:$16 sps:$4 sm:$0xff]  }
  0xc6   : > { %919 = vmatpush1.bf16.msra.mxu0 %v2719_v61  ;;  %v2833_v61 = vld [vmem:[#allocation3 + $0x204] ss:$16 sps:$4 sm:$0xff]  }
  0xc7   : > { %920 = vmatprep.subr.bf16.mxu0 %v2727_v62  ;;  %v2836_v62 = vld [vmem:[#allocation3 + $0x20c] ss:$16 sps:$4 sm:$0xff]  }
  0xca   : > { %921 = vmatpush1.bf16.msra.mxu0 %v2725_v63  ;;  %v2831_v63 = vld [vmem:[#allocation3 + $0x200] ss:$16 sps:$4 sm:$0xff]  }
  0xcb   : > { %922 = vmatprep.subr.bf16.mxu0 %v2733_v0  ;;  %v2834_v0 = vld [vmem:[#allocation3 + $0x208] ss:$16 sps:$4 sm:$0xff]  }
  0xce   : > { %923 = vmatpush1.bf16.msra.mxu0 %v2731_v1  ;;  %v2839_v1 = vld [vmem:[#allocation3 + $0x3e4] ss:$16 sps:$4 sm:$0xff]  }
  0xcf   : > { %924 = vmatprep.subr.bf16.mxu0 %v2739_v2  ;;  %v2842_v2 = vld [vmem:[#allocation3 + $0x3ec] ss:$16 sps:$4 sm:$0xff]  }
  0xd2   : > { %925 = vmatpush1.bf16.msra.mxu0 %v2737_v3  ;;  %v2837_v3 = vld [vmem:[#allocation3 + $0x3e0] ss:$16 sps:$4 sm:$0xff]  }
  0xd3   : > { %926 = vmatprep.subr.bf16.mxu0 %v2745_v4  ;;  %v2840_v4 = vld [vmem:[#allocation3 + $0x3e8] ss:$16 sps:$4 sm:$0xff]  }
  0xd6   : > { %927 = vmatpush2.bf16.msra.mxu0 %v2743_v5  ;;  %v2845_v5 = vld [vmem:[#allocation3 + $0x3c4] ss:$16 sps:$4 sm:$0xff]  }
  0xd7   : > { %928 = vmatprep.subr.bf16.mxu0 %v2751_v6  ;;  %v2848_v6 = vld [vmem:[#allocation3 + $0x3cc] ss:$16 sps:$4 sm:$0xff]  }
  0xda   : > { %929 = vmatpush2.bf16.msra.mxu0 %v2749_v7  ;;  %v2843_v7 = vld [vmem:[#allocation3 + $0x3c0] ss:$16 sps:$4 sm:$0xff]  }
  0xdb   : > { %930 = vmatprep.subr.bf16.mxu0 %v2757_v9  ;;  %v2846_v9 = vld [vmem:[#allocation3 + $0x3c8] ss:$16 sps:$4 sm:$0xff]  }
  0xde   : > { %931 = vmatpush2.bf16.msra.mxu0 %v2755_v10  ;;  %v2851_v10 = vld [vmem:[#allocation3 + $0x3a4] ss:$16 sps:$4 sm:$0xff]  }
  0xdf   : > { %932 = vmatprep.subr.bf16.mxu0 %v2763_v11  ;;  %v2854_v11 = vld [vmem:[#allocation3 + $0x3ac] ss:$16 sps:$4 sm:$0xff]  }
  0xe2   : > { %933 = vmatpush2.bf16.msra.mxu0 %v2761_v12  ;;  %v2849_v12 = vld [vmem:[#allocation3 + $0x3a0] ss:$16 sps:$4 sm:$0xff]  }
  0xe3   : > { %934 = vmatprep.subr.bf16.mxu0 %v2769_v13  ;;  %v2852_v13 = vld [vmem:[#allocation3 + $0x3a8] ss:$16 sps:$4 sm:$0xff]  }
  0xe6   : > { %935 = vmatpush2.bf16.msra.mxu0 %v2767_v14  ;;  %v2857_v14 = vld [vmem:[#allocation3 + $0x384] ss:$16 sps:$4 sm:$0xff]  }
  0xe7   : > { %936 = vmatprep.subr.bf16.mxu0 %v2775_v15  ;;  %v2860_v15 = vld [vmem:[#allocation3 + $0x38c] ss:$16 sps:$4 sm:$0xff]  }
  0xea   : > { %937 = vmatpush2.bf16.msra.mxu0 %v2773_v16  ;;  %v2855_v16 = vld [vmem:[#allocation3 + $0x380] ss:$16 sps:$4 sm:$0xff]  }
  0xeb   : > { %938 = vmatprep.subr.bf16.mxu0 %v2781_v17  ;;  %v2858_v17 = vld [vmem:[#allocation3 + $0x388] ss:$16 sps:$4 sm:$0xff]  }
  0xee   : > { %939 = vmatpush2.bf16.msra.mxu0 %v2779_v18  ;;  %v2863_v18 = vld [vmem:[#allocation3 + $0x364] ss:$16 sps:$4 sm:$0xff]  }
  0xef   : > { %940 = vmatprep.subr.bf16.mxu0 %v2787_v21  ;;  %v2866_v21 = vld [vmem:[#allocation3 + $0x36c] ss:$16 sps:$4 sm:$0xff]  }
  0xf2   : > { %941 = vmatpush2.bf16.msra.mxu0 %v2785_v22  ;;  %v2869_v22 = vld [vmem:[#allocation3 + $0x344] ss:$16 sps:$4 sm:$0xff]  }
  0xf3   : > { %1449 = vmatprep.subr.bf16.mxu0 %v2794_v28  ;;  %v3365_v28 = vld [vmem:[#allocation2 + $0x8] sm:$0xff] }
 0x175   : > { %v450_v29 = vpop.f32.mrf.mxu0 }
 0x177   : > { %v2597_v30 = vpop.f32.mrf.mxu0 }
 0x178   : > { %v2875_v30 = vld [vmem:[#allocation3 + $0x324] ss:$16 sps:$4 sm:$0xff]  }
 0x179   : > { %v453_v31 = vpop.f32.mrf.mxu0 }
 0x17a   : > { %v459_v34 = vpack.c.bf16 %v453_v31, %v450_v29  ;;  %v3367_v29 = vld [vmem:[#allocation2] sm:$0xff]  ;;  %v2878_v31 = vld [vmem:[#allocation3 + $0x32c] ss:$16 sps:$4 sm:$0xff]  }
 0x17b   : > { %v2598_v35 = vpop.f32.mrf.mxu0 }
 0x17c   : > { %900 = vmatmul.mubr.bf16.vlgmr.msra.gmra.mxu1 %v459_v34  ;;  %943 = vmatmul.mubr.bf16.vlgmr.msra.gmra.mxu0 %v459_v34  ;;  %v2876_v34 = vld [vmem:[#allocation3 + $0x328] ss:$16 sps:$4 sm:$0xff]   ;;  %v2881_v35 = vld [vmem:[#allocation3 + $0x304] ss:$16 sps:$4 sm:$0xff]  }
 0x17d   : > { %1407 = vmatpush1.bf16.msra.mxu1 %v2789_v32  ;;  %1450 = vmatpush1.bf16.msra.mxu0 %v2792_v33  ;;  %v997_v32 = vpack.c.bf16 %v3367_v29, %v3365_v28  ;;  %v2873_v33 = vld [vmem:[#allocation3 + $0x320] ss:$16 sps:$4 sm:$0xff]  }
 0x17e   : > { %1408 = vmatprep.subr.bf16.mxu1 %v2797_v36  ;;  %1451 = vmatprep.subr.bf16.mxu0 %v2800_v37  ;;  %v2884_v36 = vld [vmem:[#allocation3 + $0x30c] ss:$16 sps:$4 sm:$0xff]   ;;  %v2879_v37 = vld [vmem:[#allocation3 + $0x300] ss:$16 sps:$4 sm:$0xff]  }
 0x17f   : > { %1438 = vmatprep.mubr.bf16.mxu1 %v997_v32  ;;  %1481 = vmatprep.mubr.bf16.mxu0 %v997_v32 }
 0x181   : > { %1409 = vmatpush1.bf16.msra.mxu1 %v2795_v38  ;;  %1452 = vmatpush1.bf16.msra.mxu0 %v2798_v39  ;;  %v2882_v38 = vld [vmem:[#allocation3 + $0x308] ss:$16 sps:$4 sm:$0xff]   ;;  %v2887_v39 = vld [vmem:[#allocation3 + $0x4e4] ss:$16 sps:$4 sm:$0xff]  }
 0x182   : > { %1410 = vmatprep.subr.bf16.mxu1 %v2803_v40  ;;  %1453 = vmatprep.subr.bf16.mxu0 %v2806_v41  ;;  %v2890_v40 = vld [vmem:[#allocation3 + $0x4ec] ss:$16 sps:$4 sm:$0xff]   ;;  %v528_v41 = vshrl.u32 %v337_v48, 7 }
 0x185   : > { %1411 = vmatpush1.bf16.msra.mxu1 %v2801_v42  ;;  %1454 = vmatpush1.bf16.msra.mxu0 %v2804_v43  ;;  %v3372_v42 = vsub.s32 0, %v528_v41  ;;  %v525_v43 = vld [vmem:[%s3519_s4] sm:$0xf] }
 0x186   : > { %1412 = vmatprep.subr.bf16.mxu1 %v2809_v44  ;;  %1455 = vmatprep.subr.bf16.mxu0 %v2812_v45  ;;  %v3378_v45 = vsub.s32 1, %v528_v41 }
 0x187   : > { %v530_v44 = vrot.slane %v525_v43, %v3372_v42 }
 0x189   : > { %1413 = vmatpush1.bf16.msra.mxu1 %v2807_v46  ;;  %1456 = vmatpush1.bf16.msra.mxu0 %v2810_v47 }
 0x18a   : > { %1414 = vmatprep.subr.bf16.mxu1 %v2815_v49  ;;  %1457 = vmatprep.subr.bf16.mxu0 %v2818_v50 }
 0x18d   : > { %1415 = vmatpush1.bf16.msra.mxu1 %v2813_v51  ;;  %1458 = vmatpush1.bf16.msra.mxu0 %v2816_v52  ;;  %v534_v51 = vrot.slane %v525_v43, %v3378_v45 }
 0x18e   : > { %1416 = vmatprep.subr.bf16.mxu1 %v2821_v53  ;;  %1459 = vmatprep.subr.bf16.mxu0 %v2824_v54 }
 0x191   : > { %1417 = vmatpush1.bf16.msra.mxu1 %v2819_v55  ;;  %1460 = vmatpush1.bf16.msra.mxu0 %v2822_v56 }
 0x192   : > { %1418 = vmatprep.subr.bf16.mxu1 %v2827_v57  ;;  %1461 = vmatprep.subr.bf16.mxu0 %v2830_v58 }
 0x195   : > { %1419 = vmatpush1.bf16.msra.mxu1 %v2825_v59  ;;  %1462 = vmatpush1.bf16.msra.mxu0 %v2828_v60 }
 0x196   : > { %1420 = vmatprep.subr.bf16.mxu1 %v2833_v61  ;;  %1463 = vmatprep.subr.bf16.mxu0 %v2836_v62 }
 0x199   : > { %1421 = vmatpush1.bf16.msra.mxu1 %v2831_v63  ;;  %1464 = vmatpush1.bf16.msra.mxu0 %v2834_v0  ;;  %v3381_v0 = vsub.s32 3, %v528_v41 }
 0x19a   : > { %1422 = vmatprep.subr.bf16.mxu1 %v2839_v1  ;;  %1465 = vmatprep.subr.bf16.mxu0 %v2842_v2  ;;  %v3383_v2 = vsub.s32 2, %v528_v41  ;;  %v2893_v41 = vld [vmem:[#allocation3 + $0x4c4] ss:$16 sps:$4 sm:$0xff]  }
 0x19d   : > { %1423 = vmatpush2.bf16.msra.mxu1 %v2837_v3  ;;  %1466 = vmatpush2.bf16.msra.mxu0 %v2840_v4  ;;  %v542_v4 = vrot.slane %v525_v43, %v3381_v0 }
 0x19e   : > { %1424 = vmatprep.subr.bf16.mxu1 %v2845_v5  ;;  %1467 = vmatprep.subr.bf16.mxu0 %v2848_v6 }
 0x1a1   : > { %1425 = vmatpush2.bf16.msra.mxu1 %v2843_v7  ;;  %1468 = vmatpush2.bf16.msra.mxu0 %v2846_v9  ;;  %v538_v7 = vrot.slane %v525_v43, %v3383_v2  ;;  %v2896_v43 = vld [vmem:[#allocation3 + $0x4cc] ss:$16 sps:$4 sm:$0xff]  }
 0x1a2   : > { %1426 = vmatprep.subr.bf16.mxu1 %v2851_v10  ;;  %1469 = vmatprep.subr.bf16.mxu0 %v2854_v11 }
 0x1a5   : > { %1427 = vmatpush2.bf16.msra.mxu1 %v2849_v12  ;;  %1470 = vmatpush2.bf16.msra.mxu0 %v2852_v13 }
 0x1a6   : > { %1428 = vmatprep.subr.bf16.mxu1 %v2857_v14  ;;  %1471 = vmatprep.subr.bf16.mxu0 %v2860_v15 }
 0x1a9   : > { %1429 = vmatpush2.bf16.msra.mxu1 %v2855_v16  ;;  %1472 = vmatpush2.bf16.msra.mxu0 %v2858_v17 }
 0x1aa   : > { %1430 = vmatprep.subr.bf16.mxu1 %v2863_v18  ;;  %1473 = vmatprep.subr.bf16.mxu0 %v2866_v21 }
 0x1ad   : > { %1431 = vmatpush2.bf16.msra.mxu1 %v2861_v19  ;;  %1474 = vmatpush2.bf16.msra.mxu0 %v2864_v20 }
 0x1ae   : > { %1432 = vmatprep.subr.bf16.mxu1 %v2869_v22  ;;  %1475 = vmatprep.subr.bf16.mxu0 %v2872_v23 }
 0x1b1   : > { %1433 = vmatpush2.bf16.msra.mxu1 %v2867_v26  ;;  %1476 = vmatpush2.bf16.msra.mxu0 %v2870_v27 }
 0x1b2   : > { %1434 = vmatprep.subr.bf16.mxu1 %v2875_v30  ;;  %1477 = vmatprep.subr.bf16.mxu0 %v2878_v31 }
 0x1b5   : > { %1435 = vmatpush2.bf16.msra.mxu1 %v2873_v33  ;;  %1478 = vmatpush2.bf16.msra.mxu0 %v2876_v34 }
 0x1b6   : > { %1436 = vmatprep.subr.bf16.mxu1 %v2881_v35  ;;  %1479 = vmatprep.subr.bf16.mxu0 %v2884_v36 }
 0x1b9   : > { %1437 = vmatpush2.bf16.msra.mxu1 %v2879_v37  ;;  %1480 = vmatpush2.bf16.msra.mxu0 %v2882_v38  ;;  %v2885_v38 = vld [vmem:[#allocation3 + $0x4e0] ss:$16 sps:$4 sm:$0xff]  }
 0x1ba   : > { %1945 = vmatprep.subr.bf16.mxu1 %v2887_v39  ;;  %1988 = vmatprep.subr.bf16.mxu0 %v2890_v40  ;;  %v2888_v39 = vld [vmem:[#allocation3 + $0x4e8] ss:$16 sps:$4 sm:$0xff]  }
 0x23c   : > { %v901_v46 = vpop.f32.mrf.mxu1  ;;  %v944_v62 = vpop.f32.mrf.mxu0 }
 0x23d   : > { %v902_v47 = vadd.f32 %v901_v46, %v530_v44  ;;  %v945_v14 = vadd.f32 %v944_v62, %v538_v7  ;;  %v2899_v46 = vld [vmem:[#allocation3 + $0x4a4] ss:$16 sps:$4 sm:$0xff]   ;;  %v2926_v62 = vld [vmem:[#allocation3 + $0x42c] ss:$16 sps:$4 sm:$0xff]  }
 0x23e   : > { %v903_v49 = vpop.f32.mrf.mxu1  ;;  %v946_v1 = vpop.f32.mrf.mxu0 }
 0x23f   : > { %v2400_v50 = vmul.f32 -1.442695, %v902_v47  ;;  %v904_v48 = vadd.f32 %v903_v49, %v534_v51  ;;  %v947_v10 = vadd.f32 %v946_v1, %v542_v4  ;;  %v2897_v47 = vld [vmem:[#allocation3 + $0x4a0] ss:$16 sps:$4 sm:$0xff]   ;;  %v2900_v49 = vld [vmem:[#allocation3 + $0x4a8] ss:$16 sps:$4 sm:$0xff]  }
 0x240   : > { %v905_v52 = vpop.f32.mrf.mxu1  ;;  %v948_v5 = vpop.f32.mrf.mxu0  ;;  %v2924_v1 = vld [vmem:[#allocation3 + $0x428] ss:$16 sps:$4 sm:$0xff]  }
 0x241   : > { %2989 = vpow2.f32 %v2400_v50  ;;  %v906_v53 = vadd.f32 %v905_v52, %v530_v44  ;;  %v2402_v57 = vmul.f32 -1.442695, %v904_v48  ;;  %v949_v19 = vadd.f32 %v948_v5, %v538_v7  ;;  %v2891_v44 = vld [vmem:[#allocation3 + $0x4c0] ss:$16 sps:$4 sm:$0xff]   ;;  %v2905_v50 = vld [vmem:[#allocation3 + $0x484] ss:$16 sps:$4 sm:$0xff]  }
 0x242   : > { %v907_v55 = vpop.f32.mrf.mxu1  ;;  %v950_v13 = vpop.f32.mrf.mxu0  ;;  %v2903_v52 = vld [vmem:[#allocation3 + $0x480] ss:$16 sps:$4 sm:$0xff]   ;;  %v2911_v48 = vld [vmem:[#allocation3 + $0x464] ss:$16 sps:$4 sm:$0xff]  }
 0x243   : > { %v2401_v54 = vmul.f32 -1.442695, %v906_v53  ;;  %v908_v56 = vadd.f32 %v907_v55, %v534_v51  ;;  %v951_v17 = vadd.f32 %v950_v13, %v542_v4  ;;  %v2908_v51 = vld [vmem:[#allocation3 + $0x48c] ss:$16 sps:$4 sm:$0xff]   ;;  %v2906_v53 = vld [vmem:[#allocation3 + $0x488] ss:$16 sps:$4 sm:$0xff]  }
 0x244   : > { %v2909_v55 = vld [vmem:[#allocation3 + $0x460] ss:$16 sps:$4 sm:$0xff]   ;;  %v2932_v4 = vld [vmem:[#allocation3 + $0x40c] ss:$16 sps:$4 sm:$0xff]   ;;  %v2935_v7 = vld [vmem:[#allocation3 + $0x5e4] ss:$16 sps:$4 sm:$0xff]  }
 0x245   : > { %2991 = vpow2.f32 %v2401_v54  ;;  %v2403_v58 = vmul.f32 -1.442695, %v908_v56  ;;  %v2914_v54 = vld [vmem:[#allocation3 + $0x46c] ss:$16 sps:$4 sm:$0xff]   ;;  %v2912_v56 = vld [vmem:[#allocation3 + $0x468] ss:$16 sps:$4 sm:$0xff]  }
 0x246   : > { %2993 = vpow2.f32 %v2402_v57  ;;  %v2917_v57 = vld [vmem:[#allocation3 + $0x444] ss:$16 sps:$4 sm:$0xff]   ;;  %v2927_v5 = vld [vmem:[#allocation3 + $0x400] ss:$16 sps:$4 sm:$0xff]   ;;  %v2944_v13 = vld [vmem:[#allocation3 + $0x5cc] ss:$16 sps:$4 sm:$0xff]  }
 0x247   : > { %2995 = vpow2.f32 %v2403_v58  ;;  %v2920_v58 = vld [vmem:[#allocation3 + $0x44c] ss:$16 sps:$4 sm:$0xff]  }
 0x24e   : > { %v2990_v59 = vpop.eup %2989 }
 0x24f   : > { %v959_v60 = vadd.f32 1.0, %v2990_v59  ;;  %v2915_v59 = vld [vmem:[#allocation3 + $0x440] ss:$16 sps:$4 sm:$0xff]  }
 0x251   : > { %2997 = vrcp.f32 %v959_v60  ;;  %v2918_v60 = vld [vmem:[#allocation3 + $0x448] ss:$16 sps:$4 sm:$0xff]  }
 0x252   : > { %v2992_v61 = vpop.eup %2991 }
 0x253   : > { %v960_v63 = vadd.f32 1.0, %v2992_v61  ;;  %v2994_v3 = vpop.eup %2993  ;;  %v2923_v61 = vld [vmem:[#allocation3 + $0x424] ss:$16 sps:$4 sm:$0xff]  }
 0x254   : > { %v2996_v6 = vpop.eup %2995  ;;  %v971_v9 = vadd.f32 1.0, %v2994_v3  ;;  %v2929_v3 = vld [vmem:[#allocation3 + $0x404] ss:$16 sps:$4 sm:$0xff]  }
 0x255   : > { %2999 = vrcp.f32 %v960_v63  ;;  %v972_v12 = vadd.f32 1.0, %v2996_v6  ;;  %v2921_v63 = vld [vmem:[#allocation3 + $0x420] ss:$16 sps:$4 sm:$0xff]   ;;  %v2930_v6 = vld [vmem:[#allocation3 + $0x408] ss:$16 sps:$4 sm:$0xff]  }
 0x256   : > { %3001 = vrcp.f32 %v971_v9  ;;  %v2938_v9 = vld [vmem:[#allocation3 + $0x5ec] ss:$16 sps:$4 sm:$0xff]  }
 0x257   : > { %3003 = vrcp.f32 %v972_v12  ;;  %v2941_v12 = vld [vmem:[#allocation3 + $0x5c4] ss:$16 sps:$4 sm:$0xff]  }
 0x25e   : > { %v2998_v11 = vpop.eup %2997 }
 0x25f   : > { %v977_v15 = vmul.f32 %v2998_v11, %v947_v10  ;;  %v2933_v10 = vld [vmem:[#allocation3 + $0x5e0] ss:$16 sps:$4 sm:$0xff]   ;;  %v2936_v11 = vld [vmem:[#allocation3 + $0x5e8] ss:$16 sps:$4 sm:$0xff]  }
 0x261   : > { %v979_v16 = vadd.f32 %v977_v15, %v945_v14  ;;  %v2939_v14 = vld [vmem:[#allocation3 + $0x5c0] ss:$16 sps:$4 sm:$0xff]   ;;  %v2942_v15 = vld [vmem:[#allocation3 + $0x5c8] ss:$16 sps:$4 sm:$0xff]  }
 0x262   : > { %v3000_v18 = vpop.eup %2999 }
 0x263   : > { %3005 = vtanh.f32 %v979_v16  ;;  %v978_v20 = vmul.f32 %v3000_v18, %v951_v17  ;;  %v3002_v22 = vpop.eup %3001  ;;  %v2947_v16 = vld [vmem:[#allocation3 + $0x5a4] ss:$16 sps:$4 sm:$0xff]   ;;  %v2950_v17 = vld [vmem:[#allocation3 + $0x5ac] ss:$16 sps:$4 sm:$0xff]   ;;  %v2945_v18 = vld [vmem:[#allocation3 + $0x5a0] ss:$16 sps:$4 sm:$0xff]  }
 0x264   : > { %v3004_v23 = vpop.eup %3003  ;;  %v983_v26 = vsub.f32 1.0, %v3002_v22  ;;  %v987_v31 = vmul.f32 %v3002_v22, %v3359_v24  ;;  %v2894_v24 = vld [vmem:[#allocation3 + $0x4c8] ss:$16 sps:$4 sm:$0xff]   ;;  %v2951_v22 = vld [vmem:[#allocation3 + $0x580] ss:$16 sps:$4 sm:$0xff]  }
 0x265   : > { %v980_v21 = vadd.f32 %v978_v20, %v949_v19  ;;  %v984_v32 = vsub.f32 1.0, %v3004_v23  ;;  %v988_v36 = vmul.f32 %v3004_v23, %v3361_v25  ;;  %v2902_v25 = vld [vmem:[#allocation3 + $0x4ac] ss:$16 sps:$4 sm:$0xff]   ;;  %v2948_v19 = vld [vmem:[#allocation3 + $0x5a8] ss:$16 sps:$4 sm:$0xff]  }
 0x266   : > { %v2953_v20 = vld [vmem:[#allocation3 + $0x584] ss:$16 sps:$4 sm:$0xff]   ;;  %v2954_v23 = vld [vmem:[#allocation3 + $0x588] ss:$16 sps:$4 sm:$0xff]  }
 0x267   : > { %3007 = vtanh.f32 %v980_v21  ;;  %v2956_v21 = vld [vmem:[#allocation3 + $0x58c] ss:$16 sps:$4 sm:$0xff]  }
 0x270   : > { %v3006_v27 = vpop.eup %3005 }
 0x271   : > { %v985_v30 = vmul.f32 %v3006_v27, %v983_v26  ;;  %v2959_v26 = vld [vmem:[#allocation3 + $0x564] ss:$16 sps:$4 sm:$0xff]   ;;  %v2957_v27 = vld [vmem:[#allocation3 + $0x560] ss:$16 sps:$4 sm:$0xff]  }
 0x273   : > { %v989_v33 = vadd.f32 %v987_v31, %v985_v30  ;;  %v2960_v30 = vld [vmem:[#allocation3 + $0x568] ss:$16 sps:$4 sm:$0xff]   ;;  %v2962_v31 = vld [vmem:[#allocation3 + $0x56c] ss:$16 sps:$4 sm:$0xff]  }
 0x274   : > { %v3008_v34 = vpop.eup %3007 }
 0x275   : > { %v986_v35 = vmul.f32 %v3008_v34, %v984_v32  ;;  %991 = vst [vmem:[#allocation2 + $0x28] sm:$0xff] %v989_v33  ;;  %v2965_v32 = vld [vmem:[#allocation3 + $0x544] ss:$16 sps:$4 sm:$0xff]   ;;  %v2963_v34 = vld [vmem:[#allocation3 + $0x540] ss:$16 sps:$4 sm:$0xff]  }
 0x277   : > { %v990_v37 = vadd.f32 %v988_v36, %v986_v35  ;;  %v2966_v35 = vld [vmem:[#allocation3 + $0x548] ss:$16 sps:$4 sm:$0xff]  }
 0x278   : > { %v3389_v36 = vld [vmem:[#allocation2 + $0x18] sm:$0xff] }
 0x279   : > { %992 = vst [vmem:[#allocation2 + $0x10] sm:$0xff] %v990_v37  ;;  %v996_v40 = vpack.c.bf16 %v990_v37, %v989_v33  ;;  %v2968_v33 = vld [vmem:[#allocation3 + $0x54c] ss:$16 sps:$4 sm:$0xff]   ;;  %v3391_v37 = vld [vmem:[#allocation2 + $0x20] sm:$0xff] }
 0x27b   : > { %1439 = vmatmul.mubr.bf16.vlgmr.msra.gmra.mxu1 %v996_v40  ;;  %1482 = vmatmul.mubr.bf16.vlgmr.msra.gmra.mxu0 %v996_v40  ;;  %v1536_v40 = vpack.c.bf16 %v3391_v37, %v3389_v36 }
 0x27c   : > { %1946 = vmatpush1.bf16.msra.mxu1 %v2885_v38  ;;  %1989 = vmatpush1.bf16.msra.mxu0 %v2888_v39  ;;  %v2971_v38 = vld [vmem:[#allocation3 + $0x524] ss:$16 sps:$4 sm:$0xff]   ;;  %v2974_v39 = vld [vmem:[#allocation3 + $0x52c] ss:$16 sps:$4 sm:$0xff]  }
 0x27d   : > { %1947 = vmatprep.subr.bf16.mxu1 %v2893_v41  ;;  %1990 = vmatprep.subr.bf16.mxu0 %v2896_v43  ;;  %v2969_v41 = vld [vmem:[#allocation3 + $0x520] ss:$16 sps:$4 sm:$0xff]   ;;  %v2972_v43 = vld [vmem:[#allocation3 + $0x528] ss:$16 sps:$4 sm:$0xff]  }
 0x27e   : > { %1977 = vmatprep.mubr.bf16.mxu1 %v1536_v40  ;;  %2020 = vmatprep.mubr.bf16.mxu0 %v1536_v40 }
 0x280   : > { %1948 = vmatpush1.bf16.msra.mxu1 %v2891_v44  ;;  %1991 = vmatpush1.bf16.msra.mxu0 %v2894_v24  ;;  %v2977_v44 = vld [vmem:[#allocation3 + $0x504] ss:$16 sps:$4 sm:$0xff]   ;;  %v2980_v24 = vld [vmem:[#allocation3 + $0x50c] ss:$16 sps:$4 sm:$0xff]  }
 0x281   : > { %1949 = vmatprep.subr.bf16.mxu1 %v2899_v46  ;;  %1992 = vmatprep.subr.bf16.mxu0 %v2902_v25  ;;  %v2975_v46 = vld [vmem:[#allocation3 + $0x500] ss:$16 sps:$4 sm:$0xff]   ;;  %v2978_v25 = vld [vmem:[#allocation3 + $0x508] ss:$16 sps:$4 sm:$0xff]  }
 0x284   : > { %1950 = vmatpush1.bf16.msra.mxu1 %v2897_v47  ;;  %1993 = vmatpush1.bf16.msra.mxu0 %v2900_v49  ;;  %v2404_v47 = vld [vmem:[%s3519_s4 + $0x4] sm:$0xf] }
 0x285   : > { %1951 = vmatprep.subr.bf16.mxu1 %v2905_v50  ;;  %1994 = vmatprep.subr.bf16.mxu0 %v2908_v51  ;;  %v1069_v49 = vrot.slane %v2404_v47, %v3372_v42 }
 0x288   : > { %1952 = vmatpush1.bf16.msra.mxu1 %v2903_v52  ;;  %1995 = vmatpush1.bf16.msra.mxu0 %v2906_v53 }
 0x289   : > { %1953 = vmatprep.subr.bf16.mxu1 %v2911_v48  ;;  %1996 = vmatprep.subr.bf16.mxu0 %v2914_v54  ;;  %v1073_v48 = vrot.slane %v2404_v47, %v3378_v45 }
 0x28c   : > { %1954 = vmatpush1.bf16.msra.mxu1 %v2909_v55  ;;  %1997 = vmatpush1.bf16.msra.mxu0 %v2912_v56 }
 0x28d   : > { %1955 = vmatprep.subr.bf16.mxu1 %v2917_v57  ;;  %1998 = vmatprep.subr.bf16.mxu0 %v2920_v58 }
 0x290   : > { %1956 = vmatpush1.bf16.msra.mxu1 %v2915_v59  ;;  %1999 = vmatpush1.bf16.msra.mxu0 %v2918_v60 }
 0x291   : > { %1957 = vmatprep.subr.bf16.mxu1 %v2923_v61  ;;  %2000 = vmatprep.subr.bf16.mxu0 %v2926_v62 }
 0x294   : > { %1958 = vmatpush1.bf16.msra.mxu1 %v2921_v63  ;;  %2001 = vmatpush1.bf16.msra.mxu0 %v2924_v1 }
 0x295   : > { %1959 = vmatprep.subr.bf16.mxu1 %v2929_v3  ;;  %2002 = vmatprep.subr.bf16.mxu0 %v2932_v4 }
 0x298   : > { %1960 = vmatpush1.bf16.msra.mxu1 %v2927_v5  ;;  %2003 = vmatpush1.bf16.msra.mxu0 %v2930_v6 }
 0x299   : > { %1961 = vmatprep.subr.bf16.mxu1 %v2935_v7  ;;  %2004 = vmatprep.subr.bf16.mxu0 %v2938_v9  ;;  %v1081_v7 = vrot.slane %v2404_v47, %v3381_v0 }
 0x29c   : > { %1962 = vmatpush2.bf16.msra.mxu1 %v2933_v10  ;;  %2005 = vmatpush2.bf16.msra.mxu0 %v2936_v11  ;;  %v1077_v11 = vrot.slane %v2404_v47, %v3383_v2  ;;  %v2986_v47 = vld [vmem:[%s3520_s5 + $0x10] sm:$0xff]  }
 0x29d   : > { %1963 = vmatprep.subr.bf16.mxu1 %v2941_v12  ;;  %2006 = vmatprep.subr.bf16.mxu0 %v2944_v13 }
 0x2a0   : > { %1964 = vmatpush2.bf16.msra.mxu1 %v2939_v14  ;;  %2007 = vmatpush2.bf16.msra.mxu0 %v2942_v15 }
 0x2a1   : > { %1965 = vmatprep.subr.bf16.mxu1 %v2947_v16  ;;  %2008 = vmatprep.subr.bf16.mxu0 %v2950_v17 }
 0x2a4   : > { %1966 = vmatpush2.bf16.msra.mxu1 %v2945_v18  ;;  %2009 = vmatpush2.bf16.msra.mxu0 %v2948_v19 }
 0x2a5   : > { %1967 = vmatprep.subr.bf16.mxu1 %v2953_v20  ;;  %2010 = vmatprep.subr.bf16.mxu0 %v2956_v21 }
 0x2a8   : > { %1968 = vmatpush2.bf16.msra.mxu1 %v2951_v22  ;;  %2011 = vmatpush2.bf16.msra.mxu0 %v2954_v23 }
 0x2a9   : > { %1969 = vmatprep.subr.bf16.mxu1 %v2959_v26  ;;  %2012 = vmatprep.subr.bf16.mxu0 %v2962_v31 }
 0x2ac   : > { %1970 = vmatpush2.bf16.msra.mxu1 %v2957_v27  ;;  %2013 = vmatpush2.bf16.msra.mxu0 %v2960_v30 }
 0x2ad   : > { %1971 = vmatprep.subr.bf16.mxu1 %v2965_v32  ;;  %2014 = vmatprep.subr.bf16.mxu0 %v2968_v33 }
 0x2b0   : > { %1972 = vmatpush2.bf16.msra.mxu1 %v2963_v34  ;;  %2015 = vmatpush2.bf16.msra.mxu0 %v2966_v35 }
 0x2b1   : > { %1973 = vmatprep.subr.bf16.mxu1 %v2971_v38  ;;  %2016 = vmatprep.subr.bf16.mxu0 %v2974_v39 }
 0x2b4   : > { %1974 = vmatpush2.bf16.msra.mxu1 %v2969_v41  ;;  %2017 = vmatpush2.bf16.msra.mxu0 %v2972_v43 }
 0x2b5   : > { %1975 = vmatprep.subr.bf16.mxu1 %v2977_v44  ;;  %2018 = vmatprep.subr.bf16.mxu0 %v2980_v24  ;;  %v2981_v24 = vld [vmem:[%s3520_s5 + $0x38] sm:$0xff]  }
 0x2b8   : > { %1976 = vmatpush2.bf16.msra.mxu1 %v2975_v46  ;;  %2019 = vmatpush2.bf16.msra.mxu0 %v2978_v25  ;;  %v2984_v46 = vld [vmem:[%s3520_s5 + $0x20] sm:$0xff]   ;;  %v2985_v25 = vld [vmem:[%s3520_s5 + $0x18] sm:$0xff]  }
 0x2b9   : > { %2599 = vmatprep.subr.bf16.mxu1 %v3173_v8 }
 0x33b   : > { %v1440_v50 = vpop.f32.mrf.mxu1  ;;  %v1483_v3 = vpop.f32.mrf.mxu0 }
 0x33c   : > { %v1441_v51 = vadd.f32 %v1440_v50, %v1069_v49  ;;  %v1484_v17 = vadd.f32 %v1483_v3, %v1077_v11  ;;  %v2988_v50 = vld [vmem:[%s3520_s5] sm:$0xff]  }
 0x33d   : > { %v1442_v52 = vpop.f32.mrf.mxu1  ;;  %v1485_v5 = vpop.f32.mrf.mxu0 }
 0x33e   : > { %v2469_v53 = vmul.f32 -1.442695, %v1441_v51  ;;  %v1443_v56 = vadd.f32 %v1442_v52, %v1073_v48  ;;  %v1486_v13 = vadd.f32 %v1485_v5, %v1081_v7  ;;  %v2473_v51 = vld [vmem:[%s3519_s4 + $0x8] sm:$0xf] }
 0x33f   : > { %v1444_v54 = vpop.f32.mrf.mxu1  ;;  %v1487_v9 = vpop.f32.mrf.mxu0  ;;  %v1608_v52 = vrot.slane %v2473_v51, %v3372_v42 }
 0x340   : > { %3009 = vpow2.f32 %v2469_v53  ;;  %v1445_v55 = vadd.f32 %v1444_v54, %v1069_v49  ;;  %v2471_v60 = vmul.f32 -1.442695, %v1443_v56  ;;  %v1488_v22 = vadd.f32 %v1487_v9, %v1077_v11  ;;  %v2987_v49 = vld [vmem:[%s3520_s5 + $0x8] sm:$0xff]  }
 0x341   : > { %v1446_v58 = vpop.f32.mrf.mxu1  ;;  %v1489_v16 = vpop.f32.mrf.mxu0  ;;  %v1612_v56 = vrot.slane %v2473_v51, %v3378_v45  ;;  %v1616_v11 = vrot.slane %v2473_v51, %v3383_v2 }
 0x342   : > { %v2470_v57 = vmul.f32 -1.442695, %v1445_v55  ;;  %v1447_v59 = vadd.f32 %v1446_v58, %v1073_v48  ;;  %v1490_v20 = vadd.f32 %v1489_v16, %v1081_v7  ;;  %v1620_v7 = vrot.slane %v2473_v51, %v3381_v0 }
 0x344   : > { %3011 = vpow2.f32 %v2470_v57  ;;  %v2472_v61 = vmul.f32 -1.442695, %v1447_v59 }
 0x345   : > { %3013 = vpow2.f32 %v2471_v60 }
 0x346   : > { %3015 = vpow2.f32 %v2472_v61 }
 0x34d   : > { %v3010_v62 = vpop.eup %3009 }
 0x34e   : > { %v1498_v63 = vadd.f32 1.0, %v3010_v62 }
 0x350   : > { %3017 = vrcp.f32 %v1498_v63 }
 0x351   : > { %v3012_v1 = vpop.eup %3011 }
 0x352   : > { %v1499_v4 = vadd.f32 1.0, %v3012_v1  ;;  %v3014_v6 = vpop.eup %3013 }
 0x353   : > { %v3016_v10 = vpop.eup %3015  ;;  %v1510_v12 = vadd.f32 1.0, %v3014_v6 }
 0x354   : > { %3019 = vrcp.f32 %v1499_v4  ;;  %v1511_v15 = vadd.f32 1.0, %v3016_v10 }
 0x355   : > { %3021 = vrcp.f32 %v1510_v12 }
 0x356   : > { %3023 = vrcp.f32 %v1511_v15 }
 0x35d   : > { %v3018_v14 = vpop.eup %3017 }
 0x35e   : > { %v1516_v18 = vmul.f32 %v3018_v14, %v1486_v13 }
 0x360   : > { %v1518_v19 = vadd.f32 %v1516_v18, %v1484_v17 }
 0x361   : > { %v3020_v21 = vpop.eup %3019 }
 0x362   : > { %3025 = vtanh.f32 %v1518_v19  ;;  %v1517_v23 = vmul.f32 %v3020_v21, %v1490_v20  ;;  %v3022_v27 = vpop.eup %3021 }
 0x363   : > { %v3024_v30 = vpop.eup %3023  ;;  %v1522_v31 = vsub.f32 1.0, %v3022_v27  ;;  %v1526_v34 = vmul.f32 %v3022_v27, %v3365_v28  ;;  %v2982_v28 = vld [vmem:[%s3520_s5 + $0x30] sm:$0xff]  }
 0x364   : > { %v1519_v26 = vadd.f32 %v1517_v23, %v1488_v22  ;;  %v1523_v35 = vsub.f32 1.0, %v3024_v30  ;;  %v1527_v41 = vmul.f32 %v3024_v30, %v3367_v29  ;;  %v2983_v29 = vld [vmem:[%s3520_s5 + $0x28] sm:$0xff]  }
 0x366   : > { %3027 = vtanh.f32 %v1519_v26 }
 0x36f   : > { %v3026_v32 = vpop.eup %3025 }
 0x370   : > { %v1524_v33 = vmul.f32 %v3026_v32, %v1522_v31 }
 0x372   : > { %v1528_v38 = vadd.f32 %v1526_v34, %v1524_v33 }
 0x373   : > { %v3028_v39 = vpop.eup %3027 }
 0x374   : > { %v1525_v40 = vmul.f32 %v3028_v39, %v1523_v35  ;;  %1530 = vst [vmem:[#allocation2 + $0x8] sm:$0xff] %v1528_v38 }
 0x376   : > { %v1529_v43 = vadd.f32 %v1527_v41, %v1525_v40 }
 0x378   : > { %1531 = vst [vmem:[#allocation2] sm:$0xff] %v1529_v43  ;;  %v1535_v44 = vpack.c.bf16 %v1529_v43, %v1528_v38  ;;  %v2542_v43 = vld [vmem:[%s3521_s6] ss:$0 sm:$0xff] }
 0x37a   : > { %1978 = vmatmul.mubr.bf16.vlgmr.msra.gmra.mxu1 %v1535_v44  ;;  %2021 = vmatmul.mubr.bf16.vlgmr.msra.gmra.mxu0 %v1535_v44 }
 0x37b   : > { %2615 = vmatprep.mubr.msk.bf16.mxu1 %vm3174_vm0, %v3173_v8  ;;  %2600 = vmatpush3.bf16.msra.mxu1 %v2981_v24 }
 0x37c   : > { %2601 = vmatprep.subr.bf16.mxu1 %v3173_v8 }
 0x37f   : > { %2602 = vmatpush3.bf16.msra.mxu1 %v2982_v28 }
 0x380   : > { %2603 = vmatprep.subr.bf16.mxu1 %v3173_v8 }
 0x383   : > { %2604 = vmatpush3.bf16.msra.mxu1 %v2983_v29 }
 0x384   : > { %2605 = vmatprep.subr.bf16.mxu1 %v3173_v8 }
 0x387   : > { %2606 = vmatpush3.bf16.msra.mxu1 %v2984_v46 }
 0x388   : > { %2607 = vmatprep.subr.bf16.mxu1 %v3173_v8 }
 0x38b   : > { %2608 = vmatpush3.bf16.msra.mxu1 %v2985_v25 }
 0x38c   : > { %2609 = vmatprep.subr.bf16.mxu1 %v3173_v8 }
 0x38f   : > { %2610 = vmatpush3.bf16.msra.mxu1 %v2986_v47 }
 0x390   : > { %2611 = vmatprep.subr.bf16.mxu1 %v3173_v8 }
 0x393   : > { %2612 = vmatpush3.bf16.msra.mxu1 %v2987_v49 }
 0x394   : > { %2613 = vmatprep.subr.bf16.mxu1 %v3173_v8 }
 0x397   : > { %2614 = vmatpush3.bf16.msra.mxu1 %v2988_v50 }
 0x43a   : > { %v1979_v53 = vpop.f32.mrf.mxu1  ;;  %v2022_v4 = vpop.f32.mrf.mxu0 }
 0x43b   : > { %v1980_v48 = vadd.f32 %v1979_v53, %v1608_v52  ;;  %v2023_v17 = vadd.f32 %v2022_v4, %v1616_v11 }
 0x43c   : > { %v1981_v54 = vpop.f32.mrf.mxu1  ;;  %v2024_v45 = vpop.f32.mrf.mxu0 }
 0x43d   : > { %v2538_v55 = vmul.f32 -1.442695, %v1980_v48  ;;  %v1982_v59 = vadd.f32 %v1981_v54, %v1612_v56  ;;  %v2025_v13 = vadd.f32 %v2024_v45, %v1620_v7 }
 0x43e   : > { %v1983_v57 = vpop.f32.mrf.mxu1  ;;  %v2026_v9 = vpop.f32.mrf.mxu0 }
 0x43f   : > { %3029 = vpow2.f32 %v2538_v55  ;;  %v1984_v58 = vadd.f32 %v1983_v57, %v1608_v52  ;;  %v2540_v62 = vmul.f32 -1.442695, %v1982_v59  ;;  %v2027_v22 = vadd.f32 %v2026_v9, %v1616_v11 }
 0x440   : > { %v1985_v61 = vpop.f32.mrf.mxu1  ;;  %v2028_v16 = vpop.f32.mrf.mxu0 }
 0x441   : > { %v2539_v60 = vmul.f32 -1.442695, %v1984_v58  ;;  %v1986_v8 = vadd.f32 %v1985_v61, %v1612_v56  ;;  %v2029_v20 = vadd.f32 %v2028_v16, %v1620_v7 }
 0x443   : > { %3031 = vpow2.f32 %v2539_v60  ;;  %v2541_v63 = vmul.f32 -1.442695, %v1986_v8 }
 0x444   : > { %3033 = vpow2.f32 %v2540_v62 }
 0x445   : > { %3035 = vpow2.f32 %v2541_v63 }
 0x44c   : > { %v3030_v1 = vpop.eup %3029 }
 0x44d   : > { %v2037_v42 = vadd.f32 1.0, %v3030_v1 }
 0x44f   : > { %3037 = vrcp.f32 %v2037_v42 }
 0x450   : > { %v3032_v3 = vpop.eup %3031 }
 0x451   : > { %v2038_v5 = vadd.f32 1.0, %v3032_v3  ;;  %v3034_v6 = vpop.eup %3033 }
 0x452   : > { %v3036_v10 = vpop.eup %3035  ;;  %v2049_v12 = vadd.f32 1.0, %v3034_v6 }
 0x453   : > { %3039 = vrcp.f32 %v2038_v5  ;;  %v2050_v15 = vadd.f32 1.0, %v3036_v10 }
 0x454   : > { %3041 = vrcp.f32 %v2049_v12 }
 0x455   : > { %3043 = vrcp.f32 %v2050_v15 }
 0x45c   : > { %v3038_v14 = vpop.eup %3037 }
 0x45d   : > { %v2055_v18 = vmul.f32 %v3038_v14, %v2025_v13 }
 0x45f   : > { %v2057_v19 = vadd.f32 %v2055_v18, %v2023_v17 }
 0x460   : > { %v3040_v21 = vpop.eup %3039 }
 0x461   : > { %3045 = vtanh.f32 %v2057_v19  ;;  %v2056_v23 = vmul.f32 %v3040_v21, %v2029_v20  ;;  %v3042_v26 = vpop.eup %3041 }
 0x462   : > { %v3044_v27 = vpop.eup %3043  ;;  %v2061_v2 = vsub.f32 1.0, %v3042_v26  ;;  %v2065_v32 = vmul.f32 %v3042_v26, %v3389_v36 }
 0x463   : > { %v2058_v0 = vadd.f32 %v2056_v23, %v2027_v22  ;;  %v2062_v33 = vsub.f32 1.0, %v3044_v27  ;;  %v2066_v39 = vmul.f32 %v3044_v27, %v3391_v37 }
 0x465   : > { %3047 = vtanh.f32 %v2058_v0 }
 0x46e   : > { %v3046_v30 = vpop.eup %3045 }
 0x46f   : > { %v2063_v31 = vmul.f32 %v3046_v30, %v2061_v2 }
 0x471   : > { %v2067_v34 = vadd.f32 %v2065_v32, %v2063_v31 }
 0x472   : > { %v3048_v35 = vpop.eup %3047 }
 0x473   : > { %v2064_v38 = vmul.f32 %v3048_v35, %v2062_v33  ;;  %2069 = vst [vmem:[#allocation2 + $0x18] sm:$0xff] %v2067_v34 }
 0x475   : > { %v2068_v40 = vadd.f32 %v2066_v39, %v2064_v38 }
 0x477   : > { %2070 = vst [vmem:[#allocation2 + $0x20] sm:$0xff] %v2068_v40  ;;  %v2071_v41 = vpack.c.bf16 %v2068_v40, %v2067_v34 }
 0x479   : > { %2616 = vmatmul.mubr.bf16.vlgmr.msra.gmra.mxu1 %v2071_v41 }
 0x539   : > { %v2177_v44 = vpop.f32.mrf.mxu1 }
 0x53a   : > { %v2178_v24 = vadd.f32 %v2542_v43, %v2177_v44 }
 0x53b   : > { %v2617_v28 = vpop.f32.mrf.mxu1 }
 0x53c   : > { %2184 = vst [vmem:[%s3302_s19] sm:$0xff] %v2178_v24  ;;  %2189 = sbr.rel (%p2551_p8) target bundleno = 1349 (0x545), region = 60 }
 0x53d   : > { %v2180_v36 = vpop.f32.mrf.mxu1 }
 0x53e   : > { %v2181_v29 = vadd.f32 %v2542_v43, %v2180_v36 }
 0x53f   : > { %v2618_v46 = vpop.f32.mrf.mxu1 }
 0x540   : > { %2185 = vst [vmem:[%s3302_s19 + $0x8] sm:$0xff] %v2181_v29 }
 0x541   : > { %v2190_v37 = vld [vmem:[#allocation2 + $0x28] sm:$0xff]  ;;  %v2191_v25 = vld [vmem:[#allocation2 + $0x10] sm:$0xff]  ;;  %v2193_v49 = vld [vmem:[#allocation2] sm:$0xff] }
 0x542   : > { %v2192_v47 = vld [vmem:[#allocation2 + $0x8] sm:$0xff]  ;;  %2196 = vst [vmem:[#allocation7] sm:$0xff] %v2190_v37  ;;  %2197 = vst [vmem:[#allocation7 + $0x8] sm:$0xff] %v2191_v25  ;;  %v2194_v50 = vld [vmem:[#allocation2 + $0x18] sm:$0xff] }
 0x543   : > { %2198 = vst [vmem:[#allocation7 + $0x10] sm:$0xff] %v2192_v47  ;;  %v2195_v51 = vld [vmem:[#allocation2 + $0x20] sm:$0xff]  ;;  %2199 = vst [vmem:[#allocation7 + $0x18] sm:$0xff] %v2193_v49 }
 0x544   : > { %2200 = vst [vmem:[#allocation7 + $0x20] sm:$0xff] %v2194_v50  ;;  %2201 = vst [vmem:[#allocation7 + $0x28] sm:$0xff] %v2195_v51 }
 0x545 PF: > { %s2560_s24 = sshll.u32 %s3246_s9, 8  ;;  %s2216_s12 = sshll.u32 %s3302_s19, 4  ;;  %s3460_s12 = int_to_ptr.vmem [resolvable:$true] %s2216_s12 }
 0x546   : > { %s3457_s10 = scalar_lea.hbm %s3522_s7, %s2560_s24  ;;  %s3530_s13 = sand.u32 1, %s3159_s28  }
 0x547   : > { %s3464_s18 = scalar_lea.sflag [#allocation5], %s3530_s13  ;;  %s3075_s20 = scalar_lea.vmem %s3460_s12, 256 }
 0x548   : > { %p3076_p9 = scmp.ne.s32.totalorder %s3460_s12, %s3075_s20  ;;  %s3176_s25 = smov [#allocation6]  }
 0x549   : > { %s3079_s21 = sshll.u32 %s3176_s25, 4  ;;  %s3080_s21 = int_to_ptr.vmem [resolvable:$false] %s3079_s21 }
 0x54a   : > { %p3077_p10 = pnand %p3076_p9, %p3265_p5  ;;  %s3081_s22 = scalar_lea.vmem %s3080_s21, 512 }
 0x54b   : > { %p3082_p12 = scmp.lt.s32.totalorder %s3460_s12, %s3080_s21  ;;  %p3083_p13 = scmp.lt.s32.totalorder %s3081_s22, %s3075_s20 }
 0x54c   : > { %p3078_p11 = pneg %p3077_p10 }
 0x54d   : > { %p3084_p0 = por %p3083_p13, %p3082_p12 }
 0x54f   : > { %p3085_p1 = pnand %p3084_p0, %p3078_p11 }
 0x551   : > { %3088 = shalt.err (!%p3085_p1)
}
 0x552   : > { %s3089_s19 = scalar_lea.hbm %s3457_s10, 256  ;;  %s3093_s26 = scalar_lea.hbm %s3522_s7, 2048 }
 0x553   : > { %p3090_p3 = scmp.ne.s32.totalorder %s3457_s10, %s3089_s19  ;;  %p3094_p2 = scmp.lt.s32.totalorder %s3457_s10, %s3522_s7 }
 0x554   : > { %p3095_p6 = scmp.lt.s32.totalorder %s3093_s26, %s3089_s19 }
 0x555   : > { %p3091_p4 = pnand %p3090_p3, %p3265_p5 }
 0x556   : > { %p3096_p8 = por %p3095_p6, %p3094_p2 }
 0x557   : > { %p3092_p7 = pneg %p3091_p4 }
 0x559   : > { %p3097_p9 = pnand %p3096_p8, %p3092_p7 }
 0x55b   : > { %3100 = shalt.err (!%p3097_p9)
}
 0x55c   : > { %s3177_s20 = smov 128   ;;  %s3178_s25 = smov 8  }
 0x55d   : > { %2623 = dma.vmem_to_hbm [thread:$0]  (%p3265_p5), %s3460_s12, 256, %s3457_s10, %s3464_s18, %s3177_s20, %s3177_s20, %s3178_s25  }
 0x55e   : > { %s3179_s21 = smov [#allocation7]   ;;  %p3531_p11 = scmp.eq.s32.totalorder %s3246_s9, 7 }
 0x55f   : > { %s2229_s22 = sshll.u32 %s3179_s21, 4  ;;  %s2230_s22 = int_to_ptr.vmem [resolvable:$true] %s2229_s22 }
 0x560   : > { %s3101_s23 = scalar_lea.vmem %s2230_s22, 768  ;;  %p3108_p0 = scmp.lt.s32.totalorder %s2230_s22, %s2230_s22 }
 0x561   : > { %p3102_p10 = scmp.ne.s32.totalorder %s2230_s22, %s3101_s23  ;;  %p3109_p1 = scmp.lt.s32.totalorder %s3101_s23, %s3101_s23 }
 0x563   : > { %p3103_p12 = pnand %p3102_p10, %p3531_p11  ;;  %p3110_p3 = por %p3109_p1, %p3108_p0 }
 0x565   : > { %p3104_p13 = pneg %p3103_p12 }
 0x567   : > { %p3111_p4 = pnand %p3110_p3, %p3104_p13 }
 0x569   : > { %3114 = shalt.err (!%p3111_p4)
}
 0x56a   : > { %p3532_p7 = pmov %p3531_p11 }
 0x56c   : > { %2625 = dma.vmem_to_hbm [thread:$0]  (%p3532_p7), %s2230_s22, 768, %s3523_s8, [#allocation8], %s3177_s20, %s3177_s20, %s3178_s25  }
 0x56d   : > { %p3533_p5 = pmov %p3532_p7 }
 0x56f   : > { %3146 = dma.done.wait (%p3533_p5), [#allocation8], 768   ;;  %p3534_p2 = pmov %p3533_p5 }
 0x571   : > { %3148 = vsyncadd (%p3534_p2), [#allocation8], 4294966528 }
 0x572 PF: > { %p2641_p6 = scmp.ge.s32.totalorder %s3167_s30, 2  ;;  %s2248_s15 = sand.u32 1, %s3155_s27  }
 0x573   : > { %p3535_p8 = scmp.ne.s32.totalorder %s3527_s16, 0  ;;  %s2249_s10 = scalar_lea.sflag [#allocation5], %s2248_s15 }
 0x575   : > { %p2634_p9 = pnand %p2641_p6, %p3535_p8 }
 0x577   : > { %p2635_p10 = pneg %p2634_p9 }
 0x579   : > { %3150 = dma.done.wait (%p2635_p10), %s2249_s10, 256  }
 0x57a   : > { %3152 = vsyncadd (%p2635_p10), %s2249_s10, 4294967040  ;;  %p21_p11 = scmp.ge.s32.totalorder %s3250_s11, 10   ;;  %s3536_s27 = smov %s3159_s28 }
 0x57b   : > { %s3537_s28 = smov %s3163_s29  ;;  %s3538_s29 = smov %s3261_s14 }
 0x57c   : > { %s3539_s30 = smov %s3250_s11  ;;  %23 = sbr.rel (!%p21_p11) target bundleno = 5 (0x5), region = 110 }
 0x581   :  { %2254 = vsyncpa [#allocation4], 1 }
 0x582   :  { %2256 = vsyncpa [#allocation4 + $0x1], 1 }
 0x583   :  { %2257 = vsyncpa [#allocation5], 1 }
 0x584   :  { %2259 = vsyncpa [#allocation5 + $0x1], 1 }
 0x585   :  { %2260 = vsyncpa [#allocation8], 1 }

</bundles_post_ra>
